<compile_context>
chip_gen: v6e
topology: v6e:2x2x1
jax: 0.10.0
libtpu: 0.0.40
codegen_flags: <defaults>
</compile_context>

<pallas_src>
import jax
import jax.numpy as jnp
from jax.experimental import pallas as pl
from jax.experimental.pallas import tpu as pltpu

# ----------------------------------------------------------------------------
# Model config (matches LSTMGenerator defaults)
# ----------------------------------------------------------------------------
INPUT_FEATURES = 9
HIDDEN_DIM = 12
N_LAYERS = 2
OUTPUT_DIM = 9
BATCH_SIZE = 12
SEQ_LEN = 8


def _round_up(n, m):
    return (n + m - 1) // m * m


# ----------------------------------------------------------------------------
# Fused Pallas kernel: 2 skew-interleaved LSTM layers + linear head.
# ----------------------------------------------------------------------------
def _lstm_generator_kernel(x_ref, w_ref, hc_ref, fc_ref,
                           out_ref, hn_ref, cn_ref, y1_ref):
    H = hn_ref.shape[2]
    bp = hn_ref.shape[1]                     # padded batch (16)
    din = x_ref.shape[1]
    seq = y1_ref.shape[0] // bp

    # --- unpack the packed weight slab (loop-invariant, sliced once) ---------
    r = 0
    wih0 = w_ref[r:r + din, :]               # (din, 4H)  lane-packed gates i,f,g,o
    r += din
    whh0 = w_ref[r:r + H, :]                 # (H, 4H)
    r += H
    b0 = w_ref[r:r + 1, :]                   # (1, 4H)
    r += 1
    w1 = w_ref[r:r + 2 * H, :]               # (2H, 4H)  = [W_ih1 ; W_hh1]
    r += 2 * H
    b1 = w_ref[r:r + 1, :]                   # (1, 4H)

    # --- hoisted layer-0 input projection: one MXU pass over whole sequence --
    gx0 = jnp.dot(x_ref[...], wih0, preferred_element_type=jnp.float32) + b0

    h0 = hc_ref[0]
    h1 = hc_ref[1]
    c0 = hc_ref[2]
    c1 = hc_ref[3]

    def gate_act(g):
        i_g = jax.nn.sigmoid(g[:, 0 * H:1 * H])
        f_g = jax.nn.sigmoid(g[:, 1 * H:2 * H])
        g_g = jnp.tanh(g[:, 2 * H:3 * H])
        o_g = jax.nn.sigmoid(g[:, 3 * H:4 * H])
        return i_g, f_g, g_g, o_g

    # --- skew-interleaved recurrence: layer-0 step t, layer-1 step t-1 -------
    # TODO(synk): nn.LSTM inter-layer dropout(p=0.3) is a training-mode-only op;
    # eval/inference semantics (identity) are implemented here.
    y0_prev = None
    for t in range(seq + 1):                                 # unrolled at trace time
        if t < seq:
            lo = t * bp                                      # sublane-aligned (bp=16)
            g0 = gx0[lo:lo + bp] + jnp.dot(h0, whh0,
                                           preferred_element_type=jnp.float32)
            i0, f0, gg0, o0 = gate_act(g0)
            c0 = f0 * c0 + i0 * gg0
            h0 = o0 * jnp.tanh(c0)
        if t >= 1:
            s = t - 1
            z = jnp.concatenate([y0_prev, h1], axis=1)       # (bp, 2H)
            g1 = jnp.dot(z, w1, preferred_element_type=jnp.float32) + b1
            i1, f1, gg1, o1 = gate_act(g1)
            c1 = f1 * c1 + i1 * gg1
            h1 = o1 * jnp.tanh(c1)
            y1_ref[s * bp:(s + 1) * bp, :] = h1              # stream to scratch
        if t < seq:
            y0_prev = h0                                     # layer-1 input, next iter

    # --- final states written exactly once ------------------------------------
    hn_ref[0] = h0
    hn_ref[1] = h1
    cn_ref[0] = c0
    cn_ref[1] = c1

    # --- linear head: single matmul over the whole (S*BP, H) slab -------------
    fcw = fc_ref[0:H, :]                     # (H, OUT)
    fcb = fc_ref[H:H + 1, :]                 # (1, OUT)
    out_ref[...] = (jnp.dot(y1_ref[...], fcw, preferred_element_type=jnp.float32)
                    + fcb)


# ----------------------------------------------------------------------------
# One-time parameter packing (hoisted out of the per-call path).
# ----------------------------------------------------------------------------
def pack_params(params):
    f32 = jnp.float32
    # PyTorch W_* is (4H, d_in) with gate rows [i,f,g,o]; x @ W.T lane-packs the
    # gates along the output dim, so packing is just a transpose.
    wih0 = jnp.asarray(params["w_ih_l0"], f32).T             # (din, 4H)
    whh0 = jnp.asarray(params["w_hh_l0"], f32).T             # (H, 4H)
    b0 = (jnp.asarray(params["b_ih_l0"], f32)
          + jnp.asarray(params["b_hh_l0"], f32)).reshape(1, 4 * HIDDEN_DIM)
    wih1 = jnp.asarray(params["w_ih_l1"], f32).T             # (H, 4H)
    whh1 = jnp.asarray(params["w_hh_l1"], f32).T             # (H, 4H)
    b1 = (jnp.asarray(params["b_ih_l1"], f32)
          + jnp.asarray(params["b_hh_l1"], f32)).reshape(1, 4 * HIDDEN_DIM)

    w_lstm = jnp.concatenate([wih0, whh0, b0, wih1, whh1, b1], axis=0)  # (47, 48)
    fc = jnp.concatenate([jnp.asarray(params["fc_w"], f32).T,           # (H, OUT)
                          jnp.asarray(params["fc_b"], f32).reshape(1, OUTPUT_DIM)],
                         axis=0)                                        # (H+1, OUT)
    return {"w_lstm": w_lstm, "fc": fc}


# ----------------------------------------------------------------------------
# Jitted forward wrapper: pad batch 12->16, single pallas_call, crop padding.
# ----------------------------------------------------------------------------
@jax.jit
def lstm_generator_forward(packed, inp, hidden_cell):
    seq = inp.shape[0]
    x = inp.reshape(seq, BATCH_SIZE, -1).astype(jnp.float32)   # inp.view(len(inp), B, -1)
    din = x.shape[-1]
    h0, c0 = hidden_cell                                       # (n_layers, B, H) each

    bp = _round_up(BATCH_SIZE, 8)                              # pad batch to sublane tiles
    pad = bp - BATCH_SIZE
    x2d = jnp.pad(x, ((0, 0), (0, pad), (0, 0))).reshape(seq * bp, din)
    hc = jnp.concatenate(
        [jnp.pad(h0.astype(jnp.float32), ((0, 0), (0, pad), (0, 0))),
         jnp.pad(c0.astype(jnp.float32), ((0, 0), (0, pad), (0, 0)))],
        axis=0)                                                # (4, bp, H)

    vmem = pl.BlockSpec(memory_space=pltpu.MemorySpace.VMEM)   # whole array, VMEM resident
    out2d, hn, cn = pl.pallas_call(
        _lstm_generator_kernel,
        out_shape=(jax.ShapeDtypeStruct((seq * bp, OUTPUT_DIM), jnp.float32),
                   jax.ShapeDtypeStruct((N_LAYERS, bp, HIDDEN_DIM), jnp.float32),
                   jax.ShapeDtypeStruct((N_LAYERS, bp, HIDDEN_DIM), jnp.float32)),
        in_specs=[vmem] * 4,
        out_specs=(vmem, vmem, vmem),
        scratch_shapes=[pltpu.VMEM((seq * bp, HIDDEN_DIM), jnp.float32)],
    )(x2d, packed["w_lstm"], hc, packed["fc"])

    output = out2d.reshape(seq, bp, OUTPUT_DIM)[:, :BATCH_SIZE, :]
    return output, (hn[:, :BATCH_SIZE, :], cn[:, :BATCH_SIZE, :])


# ----------------------------------------------------------------------------
# Parameter init (deterministic; PyTorch-like shapes, uniform(-k, k),
# k = 1/sqrt(hidden_dim), as in nn.LSTM / nn.Linear defaults)
# ----------------------------------------------------------------------------
def init_params(key):
    k = 1.0 / jnp.sqrt(jnp.float32(HIDDEN_DIM))
    params = {}
    for layer in range(N_LAYERS):
        din = INPUT_FEATURES if layer == 0 else HIDDEN_DIM
        key, k1, k2, k3, k4 = jax.random.split(key, 5)
        params[f"w_ih_l{layer}"] = jax.random.uniform(
            k1, (4 * HIDDEN_DIM, din), jnp.float32, -k, k)
        params[f"w_hh_l{layer}"] = jax.random.uniform(
            k2, (4 * HIDDEN_DIM, HIDDEN_DIM), jnp.float32, -k, k)
        params[f"b_ih_l{layer}"] = jax.random.uniform(
            k3, (4 * HIDDEN_DIM,), jnp.float32, -k, k)
        params[f"b_hh_l{layer}"] = jax.random.uniform(
            k4, (4 * HIDDEN_DIM,), jnp.float32, -k, k)
    key, k5, k6 = jax.random.split(key, 3)
    params["fc_w"] = jax.random.uniform(
        k5, (OUTPUT_DIM, HIDDEN_DIM), jnp.float32, -k, k)
    params["fc_b"] = jax.random.uniform(
        k6, (OUTPUT_DIM,), jnp.float32, -k, k)
    return params


# ----------------------------------------------------------------------------
# Pure-JAX reference (for correctness check)
# ----------------------------------------------------------------------------
def _reference_forward(params, inp, hidden_cell):
    S = inp.shape[0]
    x = inp.reshape(S, BATCH_SIZE, -1).astype(jnp.float32)
    h0, c0 = hidden_cell
    H = HIDDEN_DIM
    hs, cs = [], []
    for layer in range(N_LAYERS):
        w_ih = params[f"w_ih_l{layer}"]
        w_hh = params[f"w_hh_l{layer}"]
        b = params[f"b_ih_l{layer}"] + params[f"b_hh_l{layer}"]

        def step(carry, x_t):
            h, c = carry
            gates = x_t @ w_ih.T + h @ w_hh.T + b
            i = jax.nn.sigmoid(gates[:, 0 * H:1 * H])
            f = jax.nn.sigmoid(gates[:, 1 * H:2 * H])
            g = jnp.tanh(gates[:, 2 * H:3 * H])
            o = jax.nn.sigmoid(gates[:, 3 * H:4 * H])
            c_new = f * c + i * g
            h_new = o * jnp.tanh(c_new)
            return (h_new, c_new), h_new

        (hn, cn), y = jax.lax.scan(step, (h0[layer], c0[layer]), x)
        x = y
        hs.append(hn)
        cs.append(cn)
    out = x @ params["fc_w"].T + params["fc_b"]
    return out, (jnp.stack(hs), jnp.stack(cs))


if __name__ == "__main__":
    root = jax.random.PRNGKey(0)
    key_params, key_x = jax.random.split(root)

    params = init_params(key_params)
    packed = pack_params(params)                    # one-time re-layout (hoisted)

    inp = jax.random.normal(key_x, (SEQ_LEN, BATCH_SIZE, INPUT_FEATURES),
                            jnp.float32)
    hidden_cell = (jnp.zeros((N_LAYERS, BATCH_SIZE, HIDDEN_DIM), jnp.float32),
                   jnp.zeros((N_LAYERS, BATCH_SIZE, HIDDEN_DIM), jnp.float32))

    out, (h_n, c_n) = lstm_generator_forward(packed, inp, hidden_cell)
    out = jax.block_until_ready(out)
    h_n = jax.block_until_ready(h_n)
    c_n = jax.block_until_ready(c_n)

    ref_out, (ref_h, ref_c) = _reference_forward(params, inp, hidden_cell)
    assert out.shape == (SEQ_LEN, BATCH_SIZE, OUTPUT_DIM)
    assert h_n.shape == (N_LAYERS, BATCH_SIZE, HIDDEN_DIM)
    assert c_n.shape == (N_LAYERS, BATCH_SIZE, HIDDEN_DIM)
    assert jnp.allclose(out, ref_out, atol=1e-4, rtol=1e-4)
    assert jnp.allclose(h_n, ref_h, atol=1e-4, rtol=1e-4)
    assert jnp.allclose(c_n, ref_c, atol=1e-4, rtol=1e-4)

    print("KERNEL_OK")
</pallas_src>

<mosaic_0001>
module attributes {stable_mosaic.version = 11 : i64} {
  func.func @_lstm_generator_kernel(%arg0: memref<128x9xf32, #tpu.memory_space<vmem>>, %arg1: memref<47x48xf32, #tpu.memory_space<vmem>>, %arg2: memref<4x16x12xf32, #tpu.memory_space<vmem>>, %arg3: memref<13x9xf32, #tpu.memory_space<vmem>>, %arg4: memref<128x9xf32, #tpu.memory_space<vmem>>, %arg5: memref<2x16x12xf32, #tpu.memory_space<vmem>>, %arg6: memref<2x16x12xf32, #tpu.memory_space<vmem>>, %arg7: memref<128x12xf32, #tpu.memory_space<vmem>>) attributes {dimension_semantics = [], scalar_prefetch = 0 : i64, scratch_operands = 1 : i64, tpu.core_type = #tpu.core_type<tc>} {
    %c0 = arith.constant 0 : index
    %c0_0 = arith.constant 0 : index
    %0 = vector.load %arg1[%c0, %c0_0] : memref<47x48xf32, #tpu.memory_space<vmem>>, vector<9x48xf32>
    %c9 = arith.constant 9 : index
    %c0_1 = arith.constant 0 : index
    %1 = vector.load %arg1[%c9, %c0_1] : memref<47x48xf32, #tpu.memory_space<vmem>>, vector<12x48xf32>
    %c21 = arith.constant 21 : index
    %c0_2 = arith.constant 0 : index
    %2 = vector.load %arg1[%c21, %c0_2] : memref<47x48xf32, #tpu.memory_space<vmem>>, vector<1x48xf32>
    %c22 = arith.constant 22 : index
    %c0_3 = arith.constant 0 : index
    %3 = vector.load %arg1[%c22, %c0_3] : memref<47x48xf32, #tpu.memory_space<vmem>>, vector<24x48xf32>
    %c46 = arith.constant 46 : index
    %c0_4 = arith.constant 0 : index
    %4 = vector.load %arg1[%c46, %c0_4] : memref<47x48xf32, #tpu.memory_space<vmem>>, vector<1x48xf32>
    %c0_5 = arith.constant 0 : index
    %c0_6 = arith.constant 0 : index
    %5 = vector.load %arg0[%c0_5, %c0_6] : memref<128x9xf32, #tpu.memory_space<vmem>>, vector<128x9xf32>
    %cst = arith.constant dense<0.000000e+00> : vector<128x48xf32>
    %6 = tpu.matmul %5, %0, %cst {dimension_numbers = #tpu.dot_dimension_numbers<[1], [0], [0], [1], [0, 0, 1, 1], [], []>} : vector<128x9xf32>, vector<9x48xf32>, vector<128x48xf32> -> vector<128x48xf32>
    %7 = vector.broadcast %2 : vector<1x48xf32> to vector<128x48xf32>
    %8 = arith.addf %6, %7 : vector<128x48xf32>
    %c0_7 = arith.constant 0 : index
    %c0_8 = arith.constant 0 : index
    %c0_9 = arith.constant 0 : index
    %9 = vector.load %arg2[%c0_7, %c0_8, %c0_9] : memref<4x16x12xf32, #tpu.memory_space<vmem>>, vector<1x16x12xf32>
    %10 = vector.shape_cast %9 : vector<1x16x12xf32> to vector<16x12xf32>
    %c1 = arith.constant 1 : index
    %c0_10 = arith.constant 0 : index
    %c0_11 = arith.constant 0 : index
    %11 = vector.load %arg2[%c1, %c0_10, %c0_11] : memref<4x16x12xf32, #tpu.memory_space<vmem>>, vector<1x16x12xf32>
    %12 = vector.shape_cast %11 : vector<1x16x12xf32> to vector<16x12xf32>
    %c2 = arith.constant 2 : index
    %c0_12 = arith.constant 0 : index
    %c0_13 = arith.constant 0 : index
    %13 = vector.load %arg2[%c2, %c0_12, %c0_13] : memref<4x16x12xf32, #tpu.memory_space<vmem>>, vector<1x16x12xf32>
    %14 = vector.shape_cast %13 : vector<1x16x12xf32> to vector<16x12xf32>
    %c3 = arith.constant 3 : index
    %c0_14 = arith.constant 0 : index
    %c0_15 = arith.constant 0 : index
    %15 = vector.load %arg2[%c3, %c0_14, %c0_15] : memref<4x16x12xf32, #tpu.memory_space<vmem>>, vector<1x16x12xf32>
    %16 = vector.shape_cast %15 : vector<1x16x12xf32> to vector<16x12xf32>
    %17 = vector.extract_strided_slice %8 {offsets = [0, 0], sizes = [16, 48], strides = [1, 1]} : vector<128x48xf32> to vector<16x48xf32>
    %cst_16 = arith.constant dense<0.000000e+00> : vector<16x48xf32>
    %18 = tpu.matmul %10, %1, %cst_16 {dimension_numbers = #tpu.dot_dimension_numbers<[1], [0], [0], [1], [0, 0, 1, 1], [], []>} : vector<16x12xf32>, vector<12x48xf32>, vector<16x48xf32> -> vector<16x48xf32>
    %19 = arith.addf %17, %18 : vector<16x48xf32>
    %20 = vector.extract_strided_slice %19 {offsets = [0, 0], sizes = [16, 12], strides = [1, 1]} : vector<16x48xf32> to vector<16x12xf32>
    %21 = arith.negf %20 : vector<16x12xf32>
    %22 = math.exp %21 : vector<16x12xf32>
    %cst_17 = arith.constant 1.000000e+00 : f32
    %23 = vector.broadcast %cst_17 : f32 to vector<16x12xf32>
    %24 = arith.addf %23, %22 : vector<16x12xf32>
    %25 = arith.divf %23, %24 : vector<16x12xf32>
    %26 = vector.extract_strided_slice %19 {offsets = [0, 12], sizes = [16, 12], strides = [1, 1]} : vector<16x48xf32> to vector<16x12xf32>
    %27 = arith.negf %26 : vector<16x12xf32>
    %28 = math.exp %27 : vector<16x12xf32>
    %cst_18 = arith.constant 1.000000e+00 : f32
    %29 = vector.broadcast %cst_18 : f32 to vector<16x12xf32>
    %30 = arith.addf %29, %28 : vector<16x12xf32>
    %31 = arith.divf %29, %30 : vector<16x12xf32>
    %32 = vector.extract_strided_slice %19 {offsets = [0, 24], sizes = [16, 12], strides = [1, 1]} : vector<16x48xf32> to vector<16x12xf32>
    %33 = math.tanh %32 : vector<16x12xf32>
    %34 = vector.extract_strided_slice %19 {offsets = [0, 36], sizes = [16, 12], strides = [1, 1]} : vector<16x48xf32> to vector<16x12xf32>
    %35 = arith.negf %34 : vector<16x12xf32>
    %36 = math.exp %35 : vector<16x12xf32>
    %cst_19 = arith.constant 1.000000e+00 : f32
    %37 = vector.broadcast %cst_19 : f32 to vector<16x12xf32>
    %38 = arith.addf %37, %36 : vector<16x12xf32>
    %39 = arith.divf %37, %38 : vector<16x12xf32>
    %40 = arith.mulf %31, %14 : vector<16x12xf32>
    %41 = arith.mulf %25, %33 : vector<16x12xf32>
    %42 = arith.addf %40, %41 : vector<16x12xf32>
    %43 = math.tanh %42 : vector<16x12xf32>
    %44 = arith.mulf %39, %43 : vector<16x12xf32>
    %45 = vector.extract_strided_slice %8 {offsets = [16, 0], sizes = [16, 48], strides = [1, 1]} : vector<128x48xf32> to vector<16x48xf32>
    %cst_20 = arith.constant dense<0.000000e+00> : vector<16x48xf32>
    %46 = tpu.matmul %44, %1, %cst_20 {dimension_numbers = #tpu.dot_dimension_numbers<[1], [0], [0], [1], [0, 0, 1, 1], [], []>} : vector<16x12xf32>, vector<12x48xf32>, vector<16x48xf32> -> vector<16x48xf32>
    %47 = arith.addf %45, %46 : vector<16x48xf32>
    %48 = vector.extract_strided_slice %47 {offsets = [0, 0], sizes = [16, 12], strides = [1, 1]} : vector<16x48xf32> to vector<16x12xf32>
    %49 = arith.negf %48 : vector<16x12xf32>
    %50 = math.exp %49 : vector<16x12xf32>
    %cst_21 = arith.constant 1.000000e+00 : f32
    %51 = vector.broadcast %cst_21 : f32 to vector<16x12xf32>
    %52 = arith.addf %51, %50 : vector<16x12xf32>
    %53 = arith.divf %51, %52 : vector<16x12xf32>
    %54 = vector.extract_strided_slice %47 {offsets = [0, 12], sizes = [16, 12], strides = [1, 1]} : vector<16x48xf32> to vector<16x12xf32>
    %55 = arith.negf %54 : vector<16x12xf32>
    %56 = math.exp %55 : vector<16x12xf32>
    %cst_22 = arith.constant 1.000000e+00 : f32
    %57 = vector.broadcast %cst_22 : f32 to vector<16x12xf32>
    %58 = arith.addf %57, %56 : vector<16x12xf32>
    %59 = arith.divf %57, %58 : vector<16x12xf32>
    %60 = vector.extract_strided_slice %47 {offsets = [0, 24], sizes = [16, 12], strides = [1, 1]} : vector<16x48xf32> to vector<16x12xf32>
    %61 = math.tanh %60 : vector<16x12xf32>
    %62 = vector.extract_strided_slice %47 {offsets = [0, 36], sizes = [16, 12], strides = [1, 1]} : vector<16x48xf32> to vector<16x12xf32>
    %63 = arith.negf %62 : vector<16x12xf32>
    %64 = math.exp %63 : vector<16x12xf32>
    %cst_23 = arith.constant 1.000000e+00 : f32
    %65 = vector.broadcast %cst_23 : f32 to vector<16x12xf32>
    %66 = arith.addf %65, %64 : vector<16x12xf32>
    %67 = arith.divf %65, %66 : vector<16x12xf32>
    %68 = arith.mulf %59, %42 : vector<16x12xf32>
    %69 = arith.mulf %53, %61 : vector<16x12xf32>
    %70 = arith.addf %68, %69 : vector<16x12xf32>
    %71 = math.tanh %70 : vector<16x12xf32>
    %72 = arith.mulf %67, %71 : vector<16x12xf32>
    %73 = tpu.concatenate %44, %12 in 1 : vector<16x12xf32>, vector<16x12xf32> -> vector<16x24xf32>
    %cst_24 = arith.constant dense<0.000000e+00> : vector<16x48xf32>
    %74 = tpu.matmul %73, %3, %cst_24 {dimension_numbers = #tpu.dot_dimension_numbers<[1], [0], [0], [1], [0, 0, 1, 1], [], []>} : vector<16x24xf32>, vector<24x48xf32>, vector<16x48xf32> -> vector<16x48xf32>
    %75 = vector.broadcast %4 : vector<1x48xf32> to vector<16x48xf32>
    %76 = arith.addf %74, %75 : vector<16x48xf32>
    %77 = vector.extract_strided_slice %76 {offsets = [0, 0], sizes = [16, 12], strides = [1, 1]} : vector<16x48xf32> to vector<16x12xf32>
    %78 = arith.negf %77 : vector<16x12xf32>
    %79 = math.exp %78 : vector<16x12xf32>
    %cst_25 = arith.constant 1.000000e+00 : f32
    %80 = vector.broadcast %cst_25 : f32 to vector<16x12xf32>
    %81 = arith.addf %80, %79 : vector<16x12xf32>
    %82 = arith.divf %80, %81 : vector<16x12xf32>
    %83 = vector.extract_strided_slice %76 {offsets = [0, 12], sizes = [16, 12], strides = [1, 1]} : vector<16x48xf32> to vector<16x12xf32>
    %84 = arith.negf %83 : vector<16x12xf32>
    %85 = math.exp %84 : vector<16x12xf32>
    %cst_26 = arith.constant 1.000000e+00 : f32
    %86 = vector.broadcast %cst_26 : f32 to vector<16x12xf32>
    %87 = arith.addf %86, %85 : vector<16x12xf32>
    %88 = arith.divf %86, %87 : vector<16x12xf32>
    %89 = vector.extract_strided_slice %76 {offsets = [0, 24], sizes = [16, 12], strides = [1, 1]} : vector<16x48xf32> to vector<16x12xf32>
    %90 = math.tanh %89 : vector<16x12xf32>
    %91 = vector.extract_strided_slice %76 {offsets = [0, 36], sizes = [16, 12], strides = [1, 1]} : vector<16x48xf32> to vector<16x12xf32>
    %92 = arith.negf %91 : vector<16x12xf32>
    %93 = math.exp %92 : vector<16x12xf32>
    %cst_27 = arith.constant 1.000000e+00 : f32
    %94 = vector.broadcast %cst_27 : f32 to vector<16x12xf32>
    %95 = arith.addf %94, %93 : vector<16x12xf32>
    %96 = arith.divf %94, %95 : vector<16x12xf32>
    %97 = arith.mulf %88, %16 : vector<16x12xf32>
    %98 = arith.mulf %82, %90 : vector<16x12xf32>
    %99 = arith.addf %97, %98 : vector<16x12xf32>
    %100 = math.tanh %99 : vector<16x12xf32>
    %101 = arith.mulf %96, %100 : vector<16x12xf32>
    %c0_28 = arith.constant 0 : index
    %c0_29 = arith.constant 0 : index
    %102 = vector.load %arg7[%c0_28, %c0_29] : memref<128x12xf32, #tpu.memory_space<vmem>>, vector<16x12xf32>
    tpu.vector_store %arg7[%c0_28, %c0_29], %101 {strides = array<i32>} : memref<128x12xf32, #tpu.memory_space<vmem>>, vector<16x12xf32>,
    %103 = vector.extract_strided_slice %8 {offsets = [32, 0], sizes = [16, 48], strides = [1, 1]} : vector<128x48xf32> to vector<16x48xf32>
    %cst_30 = arith.constant dense<0.000000e+00> : vector<16x48xf32>
    %104 = tpu.matmul %72, %1, %cst_30 {dimension_numbers = #tpu.dot_dimension_numbers<[1], [0], [0], [1], [0, 0, 1, 1], [], []>} : vector<16x12xf32>, vector<12x48xf32>, vector<16x48xf32> -> vector<16x48xf32>
    %105 = arith.addf %103, %104 : vector<16x48xf32>
    %106 = vector.extract_strided_slice %105 {offsets = [0, 0], sizes = [16, 12], strides = [1, 1]} : vector<16x48xf32> to vector<16x12xf32>
    %107 = arith.negf %106 : vector<16x12xf32>
    %108 = math.exp %107 : vector<16x12xf32>
    %cst_31 = arith.constant 1.000000e+00 : f32
    %109 = vector.broadcast %cst_31 : f32 to vector<16x12xf32>
    %110 = arith.addf %109, %108 : vector<16x12xf32>
    %111 = arith.divf %109, %110 : vector<16x12xf32>
    %112 = vector.extract_strided_slice %105 {offsets = [0, 12], sizes = [16, 12], strides = [1, 1]} : vector<16x48xf32> to vector<16x12xf32>
    %113 = arith.negf %112 : vector<16x12xf32>
    %114 = math.exp %113 : vector<16x12xf32>
    %cst_32 = arith.constant 1.000000e+00 : f32
    %115 = vector.broadcast %cst_32 : f32 to vector<16x12xf32>
    %116 = arith.addf %115, %114 : vector<16x12xf32>
    %117 = arith.divf %115, %116 : vector<16x12xf32>
    %118 = vector.extract_strided_slice %105 {offsets = [0, 24], sizes = [16, 12], strides = [1, 1]} : vector<16x48xf32> to vector<16x12xf32>
    %119 = math.tanh %118 : vector<16x12xf32>
    %120 = vector.extract_strided_slice %105 {offsets = [0, 36], sizes = [16, 12], strides = [1, 1]} : vector<16x48xf32> to vector<16x12xf32>
    %121 = arith.negf %120 : vector<16x12xf32>
    %122 = math.exp %121 : vector<16x12xf32>
    %cst_33 = arith.constant 1.000000e+00 : f32
    %123 = vector.broadcast %cst_33 : f32 to vector<16x12xf32>
    %124 = arith.addf %123, %122 : vector<16x12xf32>
    %125 = arith.divf %123, %124 : vector<16x12xf32>
    %126 = arith.mulf %117, %70 : vector<16x12xf32>
    %127 = arith.mulf %111, %119 : vector<16x12xf32>
    %128 = arith.addf %126, %127 : vector<16x12xf32>
    %129 = math.tanh %128 : vector<16x12xf32>
    %130 = arith.mulf %125, %129 : vector<16x12xf32>
    %131 = tpu.concatenate %72, %101 in 1 : vector<16x12xf32>, vector<16x12xf32> -> vector<16x24xf32>
    %cst_34 = arith.constant dense<0.000000e+00> : vector<16x48xf32>
    %132 = tpu.matmul %131, %3, %cst_34 {dimension_numbers = #tpu.dot_dimension_numbers<[1], [0], [0], [1], [0, 0, 1, 1], [], []>} : vector<16x24xf32>, vector<24x48xf32>, vector<16x48xf32> -> vector<16x48xf32>
    %133 = vector.broadcast %4 : vector<1x48xf32> to vector<16x48xf32>
    %134 = arith.addf %132, %133 : vector<16x48xf32>
    %135 = vector.extract_strided_slice %134 {offsets = [0, 0], sizes = [16, 12], strides = [1, 1]} : vector<16x48xf32> to vector<16x12xf32>
    %136 = arith.negf %135 : vector<16x12xf32>
    %137 = math.exp %136 : vector<16x12xf32>
    %cst_35 = arith.constant 1.000000e+00 : f32
    %138 = vector.broadcast %cst_35 : f32 to vector<16x12xf32>
    %139 = arith.addf %138, %137 : vector<16x12xf32>
    %140 = arith.divf %138, %139 : vector<16x12xf32>
    %141 = vector.extract_strided_slice %134 {offsets = [0, 12], sizes = [16, 12], strides = [1, 1]} : vector<16x48xf32> to vector<16x12xf32>
    %142 = arith.negf %141 : vector<16x12xf32>
    %143 = math.exp %142 : vector<16x12xf32>
    %cst_36 = arith.constant 1.000000e+00 : f32
    %144 = vector.broadcast %cst_36 : f32 to vector<16x12xf32>
    %145 = arith.addf %144, %143 : vector<16x12xf32>
    %146 = arith.divf %144, %145 : vector<16x12xf32>
    %147 = vector.extract_strided_slice %134 {offsets = [0, 24], sizes = [16, 12], strides = [1, 1]} : vector<16x48xf32> to vector<16x12xf32>
    %148 = math.tanh %147 : vector<16x12xf32>
    %149 = vector.extract_strided_slice %134 {offsets = [0, 36], sizes = [16, 12], strides = [1, 1]} : vector<16x48xf32> to vector<16x12xf32>
    %150 = arith.negf %149 : vector<16x12xf32>
    %151 = math.exp %150 : vector<16x12xf32>
    %cst_37 = arith.constant 1.000000e+00 : f32
    %152 = vector.broadcast %cst_37 : f32 to vector<16x12xf32>
    %153 = arith.addf %152, %151 : vector<16x12xf32>
    %154 = arith.divf %152, %153 : vector<16x12xf32>
    %155 = arith.mulf %146, %99 : vector<16x12xf32>
    %156 = arith.mulf %140, %148 : vector<16x12xf32>
    %157 = arith.addf %155, %156 : vector<16x12xf32>
    %158 = math.tanh %157 : vector<16x12xf32>
    %159 = arith.mulf %154, %158 : vector<16x12xf32>
    %c16 = arith.constant 16 : index
    %c0_38 = arith.constant 0 : index
    %160 = vector.load %arg7[%c16, %c0_38] : memref<128x12xf32, #tpu.memory_space<vmem>>, vector<16x12xf32>
    tpu.vector_store %arg7[%c16, %c0_38], %159 {strides = array<i32>} : memref<128x12xf32, #tpu.memory_space<vmem>>, vector<16x12xf32>,
    %161 = vector.extract_strided_slice %8 {offsets = [48, 0], sizes = [16, 48], strides = [1, 1]} : vector<128x48xf32> to vector<16x48xf32>
    %cst_39 = arith.constant dense<0.000000e+00> : vector<16x48xf32>
    %162 = tpu.matmul %130, %1, %cst_39 {dimension_numbers = #tpu.dot_dimension_numbers<[1], [0], [0], [1], [0, 0, 1, 1], [], []>} : vector<16x12xf32>, vector<12x48xf32>, vector<16x48xf32> -> vector<16x48xf32>
    %163 = arith.addf %161, %162 : vector<16x48xf32>
    %164 = vector.extract_strided_slice %163 {offsets = [0, 0], sizes = [16, 12], strides = [1, 1]} : vector<16x48xf32> to vector<16x12xf32>
    %165 = arith.negf %164 : vector<16x12xf32>
    %166 = math.exp %165 : vector<16x12xf32>
    %cst_40 = arith.constant 1.000000e+00 : f32
    %167 = vector.broadcast %cst_40 : f32 to vector<16x12xf32>
    %168 = arith.addf %167, %166 : vector<16x12xf32>
    %169 = arith.divf %167, %168 : vector<16x12xf32>
    %170 = vector.extract_strided_slice %163 {offsets = [0, 12], sizes = [16, 12], strides = [1, 1]} : vector<16x48xf32> to vector<16x12xf32>
    %171 = arith.negf %170 : vector<16x12xf32>
    %172 = math.exp %171 : vector<16x12xf32>
    %cst_41 = arith.constant 1.000000e+00 : f32
    %173 = vector.broadcast %cst_41 : f32 to vector<16x12xf32>
    %174 = arith.addf %173, %172 : vector<16x12xf32>
    %175 = arith.divf %173, %174 : vector<16x12xf32>
    %176 = vector.extract_strided_slice %163 {offsets = [0, 24], sizes = [16, 12], strides = [1, 1]} : vector<16x48xf32> to vector<16x12xf32>
    %177 = math.tanh %176 : vector<16x12xf32>
    %178 = vector.extract_strided_slice %163 {offsets = [0, 36], sizes = [16, 12], strides = [1, 1]} : vector<16x48xf32> to vector<16x12xf32>
    %179 = arith.negf %178 : vector<16x12xf32>
    %180 = math.exp %179 : vector<16x12xf32>
    %cst_42 = arith.constant 1.000000e+00 : f32
    %181 = vector.broadcast %cst_42 : f32 to vector<16x12xf32>
    %182 = arith.addf %181, %180 : vector<16x12xf32>
    %183 = arith.divf %181, %182 : vector<16x12xf32>
    %184 = arith.mulf %175, %128 : vector<16x12xf32>
    %185 = arith.mulf %169, %177 : vector<16x12xf32>
    %186 = arith.addf %184, %185 : vector<16x12xf32>
    %187 = math.tanh %186 : vector<16x12xf32>
    %188 = arith.mulf %183, %187 : vector<16x12xf32>
    %189 = tpu.concatenate %130, %159 in 1 : vector<16x12xf32>, vector<16x12xf32> -> vector<16x24xf32>
    %cst_43 = arith.constant dense<0.000000e+00> : vector<16x48xf32>
    %190 = tpu.matmul %189, %3, %cst_43 {dimension_numbers = #tpu.dot_dimension_numbers<[1], [0], [0], [1], [0, 0, 1, 1], [], []>} : vector<16x24xf32>, vector<24x48xf32>, vector<16x48xf32> -> vector<16x48xf32>
    %191 = vector.broadcast %4 : vector<1x48xf32> to vector<16x48xf32>
    %192 = arith.addf %190, %191 : vector<16x48xf32>
    %193 = vector.extract_strided_slice %192 {offsets = [0, 0], sizes = [16, 12], strides = [1, 1]} : vector<16x48xf32> to vector<16x12xf32>
    %194 = arith.negf %193 : vector<16x12xf32>
    %195 = math.exp %194 : vector<16x12xf32>
    %cst_44 = arith.constant 1.000000e+00 : f32
    %196 = vector.broadcast %cst_44 : f32 to vector<16x12xf32>
    %197 = arith.addf %196, %195 : vector<16x12xf32>
    %198 = arith.divf %196, %197 : vector<16x12xf32>
    %199 = vector.extract_strided_slice %192 {offsets = [0, 12], sizes = [16, 12], strides = [1, 1]} : vector<16x48xf32> to vector<16x12xf32>
    %200 = arith.negf %199 : vector<16x12xf32>
    %201 = math.exp %200 : vector<16x12xf32>
    %cst_45 = arith.constant 1.000000e+00 : f32
    %202 = vector.broadcast %cst_45 : f32 to vector<16x12xf32>
    %203 = arith.addf %202, %201 : vector<16x12xf32>
    %204 = arith.divf %202, %203 : vector<16x12xf32>
    %205 = vector.extract_strided_slice %192 {offsets = [0, 24], sizes = [16, 12], strides = [1, 1]} : vector<16x48xf32> to vector<16x12xf32>
    %206 = math.tanh %205 : vector<16x12xf32>
    %207 = vector.extract_strided_slice %192 {offsets = [0, 36], sizes = [16, 12], strides = [1, 1]} : vector<16x48xf32> to vector<16x12xf32>
    %208 = arith.negf %207 : vector<16x12xf32>
    %209 = math.exp %208 : vector<16x12xf32>
    %cst_46 = arith.constant 1.000000e+00 : f32
    %210 = vector.broadcast %cst_46 : f32 to vector<16x12xf32>
    %211 = arith.addf %210, %209 : vector<16x12xf32>
    %212 = arith.divf %210, %211 : vector<16x12xf32>
    %213 = arith.mulf %204, %157 : vector<16x12xf32>
    %214 = arith.mulf %198, %206 : vector<16x12xf32>
    %215 = arith.addf %213, %214 : vector<16x12xf32>
    %216 = math.tanh %215 : vector<16x12xf32>
    %217 = arith.mulf %212, %216 : vector<16x12xf32>
    %c32 = arith.constant 32 : index
    %c0_47 = arith.constant 0 : index
    %218 = vector.load %arg7[%c32, %c0_47] : memref<128x12xf32, #tpu.memory_space<vmem>>, vector<16x12xf32>
    tpu.vector_store %arg7[%c32, %c0_47], %217 {strides = array<i32>} : memref<128x12xf32, #tpu.memory_space<vmem>>, vector<16x12xf32>,
    %219 = vector.extract_strided_slice %8 {offsets = [64, 0], sizes = [16, 48], strides = [1, 1]} : vector<128x48xf32> to vector<16x48xf32>
    %cst_48 = arith.constant dense<0.000000e+00> : vector<16x48xf32>
    %220 = tpu.matmul %188, %1, %cst_48 {dimension_numbers = #tpu.dot_dimension_numbers<[1], [0], [0], [1], [0, 0, 1, 1], [], []>} : vector<16x12xf32>, vector<12x48xf32>, vector<16x48xf32> -> vector<16x48xf32>
    %221 = arith.addf %219, %220 : vector<16x48xf32>
    %222 = vector.extract_strided_slice %221 {offsets = [0, 0], sizes = [16, 12], strides = [1, 1]} : vector<16x48xf32> to vector<16x12xf32>
    %223 = arith.negf %222 : vector<16x12xf32>
    %224 = math.exp %223 : vector<16x12xf32>
    %cst_49 = arith.constant 1.000000e+00 : f32
    %225 = vector.broadcast %cst_49 : f32 to vector<16x12xf32>
    %226 = arith.addf %225, %224 : vector<16x12xf32>
    %227 = arith.divf %225, %226 : vector<16x12xf32>
    %228 = vector.extract_strided_slice %221 {offsets = [0, 12], sizes = [16, 12], strides = [1, 1]} : vector<16x48xf32> to vector<16x12xf32>
    %229 = arith.negf %228 : vector<16x12xf32>
    %230 = math.exp %229 : vector<16x12xf32>
    %cst_50 = arith.constant 1.000000e+00 : f32
    %231 = vector.broadcast %cst_50 : f32 to vector<16x12xf32>
    %232 = arith.addf %231, %230 : vector<16x12xf32>
    %233 = arith.divf %231, %232 : vector<16x12xf32>
    %234 = vector.extract_strided_slice %221 {offsets = [0, 24], sizes = [16, 12], strides = [1, 1]} : vector<16x48xf32> to vector<16x12xf32>
    %235 = math.tanh %234 : vector<16x12xf32>
    %236 = vector.extract_strided_slice %221 {offsets = [0, 36], sizes = [16, 12], strides = [1, 1]} : vector<16x48xf32> to vector<16x12xf32>
    %237 = arith.negf %236 : vector<16x12xf32>
    %238 = math.exp %237 : vector<16x12xf32>
    %cst_51 = arith.constant 1.000000e+00 : f32
    %239 = vector.broadcast %cst_51 : f32 to vector<16x12xf32>
    %240 = arith.addf %239, %238 : vector<16x12xf32>
    %241 = arith.divf %239, %240 : vector<16x12xf32>
    %242 = arith.mulf %233, %186 : vector<16x12xf32>
    %243 = arith.mulf %227, %235 : vector<16x12xf32>
    %244 = arith.addf %242, %243 : vector<16x12xf32>
    %245 = math.tanh %244 : vector<16x12xf32>
    %246 = arith.mulf %241, %245 : vector<16x12xf32>
    %247 = tpu.concatenate %188, %217 in 1 : vector<16x12xf32>, vector<16x12xf32> -> vector<16x24xf32>
    %cst_52 = arith.constant dense<0.000000e+00> : vector<16x48xf32>
    %248 = tpu.matmul %247, %3, %cst_52 {dimension_numbers = #tpu.dot_dimension_numbers<[1], [0], [0], [1], [0, 0, 1, 1], [], []>} : vector<16x24xf32>, vector<24x48xf32>, vector<16x48xf32> -> vector<16x48xf32>
    %249 = vector.broadcast %4 : vector<1x48xf32> to vector<16x48xf32>
    %250 = arith.addf %248, %249 : vector<16x48xf32>
    %251 = vector.extract_strided_slice %250 {offsets = [0, 0], sizes = [16, 12], strides = [1, 1]} : vector<16x48xf32> to vector<16x12xf32>
    %252 = arith.negf %251 : vector<16x12xf32>
    %253 = math.exp %252 : vector<16x12xf32>
    %cst_53 = arith.constant 1.000000e+00 : f32
    %254 = vector.broadcast %cst_53 : f32 to vector<16x12xf32>
    %255 = arith.addf %254, %253 : vector<16x12xf32>
    %256 = arith.divf %254, %255 : vector<16x12xf32>
    %257 = vector.extract_strided_slice %250 {offsets = [0, 12], sizes = [16, 12], strides = [1, 1]} : vector<16x48xf32> to vector<16x12xf32>
    %258 = arith.negf %257 : vector<16x12xf32>
    %259 = math.exp %258 : vector<16x12xf32>
    %cst_54 = arith.constant 1.000000e+00 : f32
    %260 = vector.broadcast %cst_54 : f32 to vector<16x12xf32>
    %261 = arith.addf %260, %259 : vector<16x12xf32>
    %262 = arith.divf %260, %261 : vector<16x12xf32>
    %263 = vector.extract_strided_slice %250 {offsets = [0, 24], sizes = [16, 12], strides = [1, 1]} : vector<16x48xf32> to vector<16x12xf32>
    %264 = math.tanh %263 : vector<16x12xf32>
    %265 = vector.extract_strided_slice %250 {offsets = [0, 36], sizes = [16, 12], strides = [1, 1]} : vector<16x48xf32> to vector<16x12xf32>
    %266 = arith.negf %265 : vector<16x12xf32>
    %267 = math.exp %266 : vector<16x12xf32>
    %cst_55 = arith.constant 1.000000e+00 : f32
    %268 = vector.broadcast %cst_55 : f32 to vector<16x12xf32>
    %269 = arith.addf %268, %267 : vector<16x12xf32>
    %270 = arith.divf %268, %269 : vector<16x12xf32>
    %271 = arith.mulf %262, %215 : vector<16x12xf32>
    %272 = arith.mulf %256, %264 : vector<16x12xf32>
    %273 = arith.addf %271, %272 : vector<16x12xf32>
    %274 = math.tanh %273 : vector<16x12xf32>
    %275 = arith.mulf %270, %274 : vector<16x12xf32>
    %c48 = arith.constant 48 : index
    %c0_56 = arith.constant 0 : index
    %276 = vector.load %arg7[%c48, %c0_56] : memref<128x12xf32, #tpu.memory_space<vmem>>, vector<16x12xf32>
    tpu.vector_store %arg7[%c48, %c0_56], %275 {strides = array<i32>} : memref<128x12xf32, #tpu.memory_space<vmem>>, vector<16x12xf32>,
    %277 = vector.extract_strided_slice %8 {offsets = [80, 0], sizes = [16, 48], strides = [1, 1]} : vector<128x48xf32> to vector<16x48xf32>
    %cst_57 = arith.constant dense<0.000000e+00> : vector<16x48xf32>
    %278 = tpu.matmul %246, %1, %cst_57 {dimension_numbers = #tpu.dot_dimension_numbers<[1], [0], [0], [1], [0, 0, 1, 1], [], []>} : vector<16x12xf32>, vector<12x48xf32>, vector<16x48xf32> -> vector<16x48xf32>
    %279 = arith.addf %277, %278 : vector<16x48xf32>
    %280 = vector.extract_strided_slice %279 {offsets = [0, 0], sizes = [16, 12], strides = [1, 1]} : vector<16x48xf32> to vector<16x12xf32>
    %281 = arith.negf %280 : vector<16x12xf32>
    %282 = math.exp %281 : vector<16x12xf32>
    %cst_58 = arith.constant 1.000000e+00 : f32
    %283 = vector.broadcast %cst_58 : f32 to vector<16x12xf32>
    %284 = arith.addf %283, %282 : vector<16x12xf32>
    %285 = arith.divf %283, %284 : vector<16x12xf32>
    %286 = vector.extract_strided_slice %279 {offsets = [0, 12], sizes = [16, 12], strides = [1, 1]} : vector<16x48xf32> to vector<16x12xf32>
    %287 = arith.negf %286 : vector<16x12xf32>
    %288 = math.exp %287 : vector<16x12xf32>
    %cst_59 = arith.constant 1.000000e+00 : f32
    %289 = vector.broadcast %cst_59 : f32 to vector<16x12xf32>
    %290 = arith.addf %289, %288 : vector<16x12xf32>
    %291 = arith.divf %289, %290 : vector<16x12xf32>
    %292 = vector.extract_strided_slice %279 {offsets = [0, 24], sizes = [16, 12], strides = [1, 1]} : vector<16x48xf32> to vector<16x12xf32>
    %293 = math.tanh %292 : vector<16x12xf32>
    %294 = vector.extract_strided_slice %279 {offsets = [0, 36], sizes = [16, 12], strides = [1, 1]} : vector<16x48xf32> to vector<16x12xf32>
    %295 = arith.negf %294 : vector<16x12xf32>
    %296 = math.exp %295 : vector<16x12xf32>
    %cst_60 = arith.constant 1.000000e+00 : f32
    %297 = vector.broadcast %cst_60 : f32 to vector<16x12xf32>
    %298 = arith.addf %297, %296 : vector<16x12xf32>
    %299 = arith.divf %297, %298 : vector<16x12xf32>
    %300 = arith.mulf %291, %244 : vector<16x12xf32>
    %301 = arith.mulf %285, %293 : vector<16x12xf32>
    %302 = arith.addf %300, %301 : vector<16x12xf32>
    %303 = math.tanh %302 : vector<16x12xf32>
    %304 = arith.mulf %299, %303 : vector<16x12xf32>
    %305 = tpu.concatenate %246, %275 in 1 : vector<16x12xf32>, vector<16x12xf32> -> vector<16x24xf32>
    %cst_61 = arith.constant dense<0.000000e+00> : vector<16x48xf32>
    %306 = tpu.matmul %305, %3, %cst_61 {dimension_numbers = #tpu.dot_dimension_numbers<[1], [0], [0], [1], [0, 0, 1, 1], [], []>} : vector<16x24xf32>, vector<24x48xf32>, vector<16x48xf32> -> vector<16x48xf32>
    %307 = vector.broadcast %4 : vector<1x48xf32> to vector<16x48xf32>
    %308 = arith.addf %306, %307 : vector<16x48xf32>
    %309 = vector.extract_strided_slice %308 {offsets = [0, 0], sizes = [16, 12], strides = [1, 1]} : vector<16x48xf32> to vector<16x12xf32>
    %310 = arith.negf %309 : vector<16x12xf32>
    %311 = math.exp %310 : vector<16x12xf32>
    %cst_62 = arith.constant 1.000000e+00 : f32
    %312 = vector.broadcast %cst_62 : f32 to vector<16x12xf32>
    %313 = arith.addf %312, %311 : vector<16x12xf32>
    %314 = arith.divf %312, %313 : vector<16x12xf32>
    %315 = vector.extract_strided_slice %308 {offsets = [0, 12], sizes = [16, 12], strides = [1, 1]} : vector<16x48xf32> to vector<16x12xf32>
    %316 = arith.negf %315 : vector<16x12xf32>
    %317 = math.exp %316 : vector<16x12xf32>
    %cst_63 = arith.constant 1.000000e+00 : f32
    %318 = vector.broadcast %cst_63 : f32 to vector<16x12xf32>
    %319 = arith.addf %318, %317 : vector<16x12xf32>
    %320 = arith.divf %318, %319 : vector<16x12xf32>
    %321 = vector.extract_strided_slice %308 {offsets = [0, 24], sizes = [16, 12], strides = [1, 1]} : vector<16x48xf32> to vector<16x12xf32>
    %322 = math.tanh %321 : vector<16x12xf32>
    %323 = vector.extract_strided_slice %308 {offsets = [0, 36], sizes = [16, 12], strides = [1, 1]} : vector<16x48xf32> to vector<16x12xf32>
    %324 = arith.negf %323 : vector<16x12xf32>
    %325 = math.exp %324 : vector<16x12xf32>
    %cst_64 = arith.constant 1.000000e+00 : f32
    %326 = vector.broadcast %cst_64 : f32 to vector<16x12xf32>
    %327 = arith.addf %326, %325 : vector<16x12xf32>
    %328 = arith.divf %326, %327 : vector<16x12xf32>
    %329 = arith.mulf %320, %273 : vector<16x12xf32>
    %330 = arith.mulf %314, %322 : vector<16x12xf32>
    %331 = arith.addf %329, %330 : vector<16x12xf32>
    %332 = math.tanh %331 : vector<16x12xf32>
    %333 = arith.mulf %328, %332 : vector<16x12xf32>
    %c64 = arith.constant 64 : index
    %c0_65 = arith.constant 0 : index
    %334 = vector.load %arg7[%c64, %c0_65] : memref<128x12xf32, #tpu.memory_space<vmem>>, vector<16x12xf32>
    tpu.vector_store %arg7[%c64, %c0_65], %333 {strides = array<i32>} : memref<128x12xf32, #tpu.memory_space<vmem>>, vector<16x12xf32>,
    %335 = vector.extract_strided_slice %8 {offsets = [96, 0], sizes = [16, 48], strides = [1, 1]} : vector<128x48xf32> to vector<16x48xf32>
    %cst_66 = arith.constant dense<0.000000e+00> : vector<16x48xf32>
    %336 = tpu.matmul %304, %1, %cst_66 {dimension_numbers = #tpu.dot_dimension_numbers<[1], [0], [0], [1], [0, 0, 1, 1], [], []>} : vector<16x12xf32>, vector<12x48xf32>, vector<16x48xf32> -> vector<16x48xf32>
    %337 = arith.addf %335, %336 : vector<16x48xf32>
    %338 = vector.extract_strided_slice %337 {offsets = [0, 0], sizes = [16, 12], strides = [1, 1]} : vector<16x48xf32> to vector<16x12xf32>
    %339 = arith.negf %338 : vector<16x12xf32>
    %340 = math.exp %339 : vector<16x12xf32>
    %cst_67 = arith.constant 1.000000e+00 : f32
    %341 = vector.broadcast %cst_67 : f32 to vector<16x12xf32>
    %342 = arith.addf %341, %340 : vector<16x12xf32>
    %343 = arith.divf %341, %342 : vector<16x12xf32>
    %344 = vector.extract_strided_slice %337 {offsets = [0, 12], sizes = [16, 12], strides = [1, 1]} : vector<16x48xf32> to vector<16x12xf32>
    %345 = arith.negf %344 : vector<16x12xf32>
    %346 = math.exp %345 : vector<16x12xf32>
    %cst_68 = arith.constant 1.000000e+00 : f32
    %347 = vector.broadcast %cst_68 : f32 to vector<16x12xf32>
    %348 = arith.addf %347, %346 : vector<16x12xf32>
    %349 = arith.divf %347, %348 : vector<16x12xf32>
    %350 = vector.extract_strided_slice %337 {offsets = [0, 24], sizes = [16, 12], strides = [1, 1]} : vector<16x48xf32> to vector<16x12xf32>
    %351 = math.tanh %350 : vector<16x12xf32>
    %352 = vector.extract_strided_slice %337 {offsets = [0, 36], sizes = [16, 12], strides = [1, 1]} : vector<16x48xf32> to vector<16x12xf32>
    %353 = arith.negf %352 : vector<16x12xf32>
    %354 = math.exp %353 : vector<16x12xf32>
    %cst_69 = arith.constant 1.000000e+00 : f32
    %355 = vector.broadcast %cst_69 : f32 to vector<16x12xf32>
    %356 = arith.addf %355, %354 : vector<16x12xf32>
    %357 = arith.divf %355, %356 : vector<16x12xf32>
    %358 = arith.mulf %349, %302 : vector<16x12xf32>
    %359 = arith.mulf %343, %351 : vector<16x12xf32>
    %360 = arith.addf %358, %359 : vector<16x12xf32>
    %361 = math.tanh %360 : vector<16x12xf32>
    %362 = arith.mulf %357, %361 : vector<16x12xf32>
    %363 = tpu.concatenate %304, %333 in 1 : vector<16x12xf32>, vector<16x12xf32> -> vector<16x24xf32>
    %cst_70 = arith.constant dense<0.000000e+00> : vector<16x48xf32>
    %364 = tpu.matmul %363, %3, %cst_70 {dimension_numbers = #tpu.dot_dimension_numbers<[1], [0], [0], [1], [0, 0, 1, 1], [], []>} : vector<16x24xf32>, vector<24x48xf32>, vector<16x48xf32> -> vector<16x48xf32>
    %365 = vector.broadcast %4 : vector<1x48xf32> to vector<16x48xf32>
    %366 = arith.addf %364, %365 : vector<16x48xf32>
    %367 = vector.extract_strided_slice %366 {offsets = [0, 0], sizes = [16, 12], strides = [1, 1]} : vector<16x48xf32> to vector<16x12xf32>
    %368 = arith.negf %367 : vector<16x12xf32>
    %369 = math.exp %368 : vector<16x12xf32>
    %cst_71 = arith.constant 1.000000e+00 : f32
    %370 = vector.broadcast %cst_71 : f32 to vector<16x12xf32>
    %371 = arith.addf %370, %369 : vector<16x12xf32>
    %372 = arith.divf %370, %371 : vector<16x12xf32>
    %373 = vector.extract_strided_slice %366 {offsets = [0, 12], sizes = [16, 12], strides = [1, 1]} : vector<16x48xf32> to vector<16x12xf32>
    %374 = arith.negf %373 : vector<16x12xf32>
    %375 = math.exp %374 : vector<16x12xf32>
    %cst_72 = arith.constant 1.000000e+00 : f32
    %376 = vector.broadcast %cst_72 : f32 to vector<16x12xf32>
    %377 = arith.addf %376, %375 : vector<16x12xf32>
    %378 = arith.divf %376, %377 : vector<16x12xf32>
    %379 = vector.extract_strided_slice %366 {offsets = [0, 24], sizes = [16, 12], strides = [1, 1]} : vector<16x48xf32> to vector<16x12xf32>
    %380 = math.tanh %379 : vector<16x12xf32>
    %381 = vector.extract_strided_slice %366 {offsets = [0, 36], sizes = [16, 12], strides = [1, 1]} : vector<16x48xf32> to vector<16x12xf32>
    %382 = arith.negf %381 : vector<16x12xf32>
    %383 = math.exp %382 : vector<16x12xf32>
    %cst_73 = arith.constant 1.000000e+00 : f32
    %384 = vector.broadcast %cst_73 : f32 to vector<16x12xf32>
    %385 = arith.addf %384, %383 : vector<16x12xf32>
    %386 = arith.divf %384, %385 : vector<16x12xf32>
    %387 = arith.mulf %378, %331 : vector<16x12xf32>
    %388 = arith.mulf %372, %380 : vector<16x12xf32>
    %389 = arith.addf %387, %388 : vector<16x12xf32>
    %390 = math.tanh %389 : vector<16x12xf32>
    %391 = arith.mulf %386, %390 : vector<16x12xf32>
    %c80 = arith.constant 80 : index
    %c0_74 = arith.constant 0 : index
    %392 = vector.load %arg7[%c80, %c0_74] : memref<128x12xf32, #tpu.memory_space<vmem>>, vector<16x12xf32>
    tpu.vector_store %arg7[%c80, %c0_74], %391 {strides = array<i32>} : memref<128x12xf32, #tpu.memory_space<vmem>>, vector<16x12xf32>,
    %393 = vector.extract_strided_slice %8 {offsets = [112, 0], sizes = [16, 48], strides = [1, 1]} : vector<128x48xf32> to vector<16x48xf32>
    %cst_75 = arith.constant dense<0.000000e+00> : vector<16x48xf32>
    %394 = tpu.matmul %362, %1, %cst_75 {dimension_numbers = #tpu.dot_dimension_numbers<[1], [0], [0], [1], [0, 0, 1, 1], [], []>} : vector<16x12xf32>, vector<12x48xf32>, vector<16x48xf32> -> vector<16x48xf32>
    %395 = arith.addf %393, %394 : vector<16x48xf32>
    %396 = vector.extract_strided_slice %395 {offsets = [0, 0], sizes = [16, 12], strides = [1, 1]} : vector<16x48xf32> to vector<16x12xf32>
    %397 = arith.negf %396 : vector<16x12xf32>
    %398 = math.exp %397 : vector<16x12xf32>
    %cst_76 = arith.constant 1.000000e+00 : f32
    %399 = vector.broadcast %cst_76 : f32 to vector<16x12xf32>
    %400 = arith.addf %399, %398 : vector<16x12xf32>
    %401 = arith.divf %399, %400 : vector<16x12xf32>
    %402 = vector.extract_strided_slice %395 {offsets = [0, 12], sizes = [16, 12], strides = [1, 1]} : vector<16x48xf32> to vector<16x12xf32>
    %403 = arith.negf %402 : vector<16x12xf32>
    %404 = math.exp %403 : vector<16x12xf32>
    %cst_77 = arith.constant 1.000000e+00 : f32
    %405 = vector.broadcast %cst_77 : f32 to vector<16x12xf32>
    %406 = arith.addf %405, %404 : vector<16x12xf32>
    %407 = arith.divf %405, %406 : vector<16x12xf32>
    %408 = vector.extract_strided_slice %395 {offsets = [0, 24], sizes = [16, 12], strides = [1, 1]} : vector<16x48xf32> to vector<16x12xf32>
    %409 = math.tanh %408 : vector<16x12xf32>
    %410 = vector.extract_strided_slice %395 {offsets = [0, 36], sizes = [16, 12], strides = [1, 1]} : vector<16x48xf32> to vector<16x12xf32>
    %411 = arith.negf %410 : vector<16x12xf32>
    %412 = math.exp %411 : vector<16x12xf32>
    %cst_78 = arith.constant 1.000000e+00 : f32
    %413 = vector.broadcast %cst_78 : f32 to vector<16x12xf32>
    %414 = arith.addf %413, %412 : vector<16x12xf32>
    %415 = arith.divf %413, %414 : vector<16x12xf32>
    %416 = arith.mulf %407, %360 : vector<16x12xf32>
    %417 = arith.mulf %401, %409 : vector<16x12xf32>
    %418 = arith.addf %416, %417 : vector<16x12xf32>
    %419 = math.tanh %418 : vector<16x12xf32>
    %420 = arith.mulf %415, %419 : vector<16x12xf32>
    %421 = tpu.concatenate %362, %391 in 1 : vector<16x12xf32>, vector<16x12xf32> -> vector<16x24xf32>
    %cst_79 = arith.constant dense<0.000000e+00> : vector<16x48xf32>
    %422 = tpu.matmul %421, %3, %cst_79 {dimension_numbers = #tpu.dot_dimension_numbers<[1], [0], [0], [1], [0, 0, 1, 1], [], []>} : vector<16x24xf32>, vector<24x48xf32>, vector<16x48xf32> -> vector<16x48xf32>
    %423 = vector.broadcast %4 : vector<1x48xf32> to vector<16x48xf32>
    %424 = arith.addf %422, %423 : vector<16x48xf32>
    %425 = vector.extract_strided_slice %424 {offsets = [0, 0], sizes = [16, 12], strides = [1, 1]} : vector<16x48xf32> to vector<16x12xf32>
    %426 = arith.negf %425 : vector<16x12xf32>
    %427 = math.exp %426 : vector<16x12xf32>
    %cst_80 = arith.constant 1.000000e+00 : f32
    %428 = vector.broadcast %cst_80 : f32 to vector<16x12xf32>
    %429 = arith.addf %428, %427 : vector<16x12xf32>
    %430 = arith.divf %428, %429 : vector<16x12xf32>
    %431 = vector.extract_strided_slice %424 {offsets = [0, 12], sizes = [16, 12], strides = [1, 1]} : vector<16x48xf32> to vector<16x12xf32>
    %432 = arith.negf %431 : vector<16x12xf32>
    %433 = math.exp %432 : vector<16x12xf32>
    %cst_81 = arith.constant 1.000000e+00 : f32
    %434 = vector.broadcast %cst_81 : f32 to vector<16x12xf32>
    %435 = arith.addf %434, %433 : vector<16x12xf32>
    %436 = arith.divf %434, %435 : vector<16x12xf32>
    %437 = vector.extract_strided_slice %424 {offsets = [0, 24], sizes = [16, 12], strides = [1, 1]} : vector<16x48xf32> to vector<16x12xf32>
    %438 = math.tanh %437 : vector<16x12xf32>
    %439 = vector.extract_strided_slice %424 {offsets = [0, 36], sizes = [16, 12], strides = [1, 1]} : vector<16x48xf32> to vector<16x12xf32>
    %440 = arith.negf %439 : vector<16x12xf32>
    %441 = math.exp %440 : vector<16x12xf32>
    %cst_82 = arith.constant 1.000000e+00 : f32
    %442 = vector.broadcast %cst_82 : f32 to vector<16x12xf32>
    %443 = arith.addf %442, %441 : vector<16x12xf32>
    %444 = arith.divf %442, %443 : vector<16x12xf32>
    %445 = arith.mulf %436, %389 : vector<16x12xf32>
    %446 = arith.mulf %430, %438 : vector<16x12xf32>
    %447 = arith.addf %445, %446 : vector<16x12xf32>
    %448 = math.tanh %447 : vector<16x12xf32>
    %449 = arith.mulf %444, %448 : vector<16x12xf32>
    %c96 = arith.constant 96 : index
    %c0_83 = arith.constant 0 : index
    %450 = vector.load %arg7[%c96, %c0_83] : memref<128x12xf32, #tpu.memory_space<vmem>>, vector<16x12xf32>
    tpu.vector_store %arg7[%c96, %c0_83], %449 {strides = array<i32>} : memref<128x12xf32, #tpu.memory_space<vmem>>, vector<16x12xf32>,
    %451 = tpu.concatenate %420, %449 in 1 : vector<16x12xf32>, vector<16x12xf32> -> vector<16x24xf32>
    %cst_84 = arith.constant dense<0.000000e+00> : vector<16x48xf32>
    %452 = tpu.matmul %451, %3, %cst_84 {dimension_numbers = #tpu.dot_dimension_numbers<[1], [0], [0], [1], [0, 0, 1, 1], [], []>} : vector<16x24xf32>, vector<24x48xf32>, vector<16x48xf32> -> vector<16x48xf32>
    %453 = vector.broadcast %4 : vector<1x48xf32> to vector<16x48xf32>
    %454 = arith.addf %452, %453 : vector<16x48xf32>
    %455 = vector.extract_strided_slice %454 {offsets = [0, 0], sizes = [16, 12], strides = [1, 1]} : vector<16x48xf32> to vector<16x12xf32>
    %456 = arith.negf %455 : vector<16x12xf32>
    %457 = math.exp %456 : vector<16x12xf32>
    %cst_85 = arith.constant 1.000000e+00 : f32
    %458 = vector.broadcast %cst_85 : f32 to vector<16x12xf32>
    %459 = arith.addf %458, %457 : vector<16x12xf32>
    %460 = arith.divf %458, %459 : vector<16x12xf32>
    %461 = vector.extract_strided_slice %454 {offsets = [0, 12], sizes = [16, 12], strides = [1, 1]} : vector<16x48xf32> to vector<16x12xf32>
    %462 = arith.negf %461 : vector<16x12xf32>
    %463 = math.exp %462 : vector<16x12xf32>
    %cst_86 = arith.constant 1.000000e+00 : f32
    %464 = vector.broadcast %cst_86 : f32 to vector<16x12xf32>
    %465 = arith.addf %464, %463 : vector<16x12xf32>
    %466 = arith.divf %464, %465 : vector<16x12xf32>
    %467 = vector.extract_strided_slice %454 {offsets = [0, 24], sizes = [16, 12], strides = [1, 1]} : vector<16x48xf32> to vector<16x12xf32>
    %468 = math.tanh %467 : vector<16x12xf32>
    %469 = vector.extract_strided_slice %454 {offsets = [0, 36], sizes = [16, 12], strides = [1, 1]} : vector<16x48xf32> to vector<16x12xf32>
    %470 = arith.negf %469 : vector<16x12xf32>
    %471 = math.exp %470 : vector<16x12xf32>
    %cst_87 = arith.constant 1.000000e+00 : f32
    %472 = vector.broadcast %cst_87 : f32 to vector<16x12xf32>
    %473 = arith.addf %472, %471 : vector<16x12xf32>
    %474 = arith.divf %472, %473 : vector<16x12xf32>
    %475 = arith.mulf %466, %447 : vector<16x12xf32>
    %476 = arith.mulf %460, %468 : vector<16x12xf32>
    %477 = arith.addf %475, %476 : vector<16x12xf32>
    %478 = math.tanh %477 : vector<16x12xf32>
    %479 = arith.mulf %474, %478 : vector<16x12xf32>
    %c112 = arith.constant 112 : index
    %c0_88 = arith.constant 0 : index
    %480 = vector.load %arg7[%c112, %c0_88] : memref<128x12xf32, #tpu.memory_space<vmem>>, vector<16x12xf32>
    tpu.vector_store %arg7[%c112, %c0_88], %479 {strides = array<i32>} : memref<128x12xf32, #tpu.memory_space<vmem>>, vector<16x12xf32>,
    %c0_89 = arith.constant 0 : index
    %c0_90 = arith.constant 0 : index
    %c0_91 = arith.constant 0 : index
    %481 = vector.load %arg5[%c0_89, %c0_90, %c0_91] : memref<2x16x12xf32, #tpu.memory_space<vmem>>, vector<1x16x12xf32>
    %482 = vector.shape_cast %481 : vector<1x16x12xf32> to vector<16x12xf32>
    %483 = vector.shape_cast %420 : vector<16x12xf32> to vector<1x16x12xf32>
    tpu.vector_store %arg5[%c0_89, %c0_90, %c0_91], %483 {strides = array<i32>} : memref<2x16x12xf32, #tpu.memory_space<vmem>>, vector<1x16x12xf32>,
    %c1_92 = arith.constant 1 : index
    %c0_93 = arith.constant 0 : index
    %c0_94 = arith.constant 0 : index
    %484 = vector.load %arg5[%c1_92, %c0_93, %c0_94] : memref<2x16x12xf32, #tpu.memory_space<vmem>>, vector<1x16x12xf32>
    %485 = vector.shape_cast %484 : vector<1x16x12xf32> to vector<16x12xf32>
    %486 = vector.shape_cast %479 : vector<16x12xf32> to vector<1x16x12xf32>
    tpu.vector_store %arg5[%c1_92, %c0_93, %c0_94], %486 {strides = array<i32>} : memref<2x16x12xf32, #tpu.memory_space<vmem>>, vector<1x16x12xf32>,
    %c0_95 = arith.constant 0 : index
    %c0_96 = arith.constant 0 : index
    %c0_97 = arith.constant 0 : index
    %487 = vector.load %arg6[%c0_95, %c0_96, %c0_97] : memref<2x16x12xf32, #tpu.memory_space<vmem>>, vector<1x16x12xf32>
    %488 = vector.shape_cast %487 : vector<1x16x12xf32> to vector<16x12xf32>
    %489 = vector.shape_cast %418 : vector<16x12xf32> to vector<1x16x12xf32>
    tpu.vector_store %arg6[%c0_95, %c0_96, %c0_97], %489 {strides = array<i32>} : memref<2x16x12xf32, #tpu.memory_space<vmem>>, vector<1x16x12xf32>,
    %c1_98 = arith.constant 1 : index
    %c0_99 = arith.constant 0 : index
    %c0_100 = arith.constant 0 : index
    %490 = vector.load %arg6[%c1_98, %c0_99, %c0_100] : memref<2x16x12xf32, #tpu.memory_space<vmem>>, vector<1x16x12xf32>
    %491 = vector.shape_cast %490 : vector<1x16x12xf32> to vector<16x12xf32>
    %492 = vector.shape_cast %477 : vector<16x12xf32> to vector<1x16x12xf32>
    tpu.vector_store %arg6[%c1_98, %c0_99, %c0_100], %492 {strides = array<i32>} : memref<2x16x12xf32, #tpu.memory_space<vmem>>, vector<1x16x12xf32>,
    %c0_101 = arith.constant 0 : index
    %c0_102 = arith.constant 0 : index
    %493 = vector.load %arg3[%c0_101, %c0_102] : memref<13x9xf32, #tpu.memory_space<vmem>>, vector<12x9xf32>
    %c12 = arith.constant 12 : index
    %c0_103 = arith.constant 0 : index
    %494 = vector.load %arg3[%c12, %c0_103] : memref<13x9xf32, #tpu.memory_space<vmem>>, vector<1x9xf32>
    %c0_104 = arith.constant 0 : index
    %c0_105 = arith.constant 0 : index
    %495 = vector.load %arg7[%c0_104, %c0_105] : memref<128x12xf32, #tpu.memory_space<vmem>>, vector<128x12xf32>
    %cst_106 = arith.constant dense<0.000000e+00> : vector<128x9xf32>
    %496 = tpu.matmul %495, %493, %cst_106 {dimension_numbers = #tpu.dot_dimension_numbers<[1], [0], [0], [1], [0, 0, 1, 1], [], []>} : vector<128x12xf32>, vector<12x9xf32>, vector<128x9xf32> -> vector<128x9xf32>
    %497 = vector.broadcast %494 : vector<1x9xf32> to vector<128x9xf32>
    %498 = arith.addf %496, %497 : vector<128x9xf32>
    %c0_107 = arith.constant 0 : index
    %c0_108 = arith.constant 0 : index
    %499 = vector.load %arg4[%c0_107, %c0_108] : memref<128x9xf32, #tpu.memory_space<vmem>>, vector<128x9xf32>
    tpu.vector_store %arg4[%c0_107, %c0_108], %498 {strides = array<i32>} : memref<128x9xf32, #tpu.memory_space<vmem>>, vector<128x9xf32>,
    return
  }
}

</mosaic_0001>

<bundles_post_ra>
// kernel: lstm_generator_forward.1
= control target key start
LH: loop header
LB: loop body
LE: loop exit
PB: predicated region body
PF: predicated region fallthrough
CT: control target
= control target key end

     0   :  { %vm98_vm0 = vcmask 1040384   ;;  %vm49_vm1 = vcmask 72704   ;;  %vm265_vm2 = vcmask 1043456   ;;  %s3516_s23 = smov 12   ;;  %vm258_vm3 = vcmask 97280   ;;  %s3517_s14 = smov 104   ;;  %s4371_s1 = inlined_call_operand.vmem [shape: f32[47,48], index: 1, kind: input, shape index: {}]   ;;  %s4372_s0 = inlined_call_operand.vmem [shape: f32[128,9], index: 0, kind: input, shape index: {}]   ;;  %s4373_s2 = inlined_call_operand.vmem [shape: f32[4,16,12], index: 2, kind: input, shape index: {}]   ;;  %s4374_s5 = inlined_call_operand.vmem [shape: f32[2,16,12], index: 5, kind: output, shape index: {1}]   ;;  %s4375_s3 = inlined_call_operand.vmem [shape: f32[13,9], index: 3, kind: input, shape index: {}]   ;;  %s4376_s6 = inlined_call_operand.vmem [shape: f32[2,16,12], index: 6, kind: output, shape index: {2}]   ;;  %s4377_s4 = inlined_call_operand.vmem [shape: f32[128,9], index: 4, kind: output, shape index: {0}]  }
   0x1   :  { %v21_v0 = vld [vmem:[%s4371_s1 + $0x8] sm:$0x1]  ;;  %v3562_v1 = vld [vmem:[%s4371_s1 + $0x11] sm:$0xf]  ;;  %v20_v2 = vld [vmem:[%s4371_s1] sm:$0xff]  ;;  %s3518_s15 = smov 24  }
   0x2   :  { %3244 = vmatprep.subr.msk.mxu1 %vm98_vm0, %v21_v0  ;;  %3060 = vmatprep.subr.msk.mxu0 %vm98_vm0, %v21_v0  ;;  %v37_v3 = vld [vmem:[%s4372_s0 + $0x40] sm:$0xff]  ;;  %v38_v4 = vld [vmem:[%s4372_s0 + $0x48] sm:$0xff]  ;;  %v39_v5 = vld [vmem:[%s4372_s0 + $0x50] sm:$0xff]  ;;  %s3519_s20 = smov 92   ;;  %vm553_vm4 = vcmask 195584  }
   0x3   :  { %3246 = vmatpush3.msk.msra.mxu1 %vm98_vm0, %v21_v0  ;;  %3061 = vmatpush3.msk.msra.mxu0 %vm98_vm0, %v21_v0  ;;  %v3579_v6 = vld [vmem:[%s4371_s1 + $0x9] sm:$0xff]  ;;  %v29_v7 = vld [vmem:[%s4372_s0] sm:$0xff]  ;;  %v40_v8 = vld [vmem:[%s4372_s0 + $0x58] sm:$0xff] }
   0x4   :  { %3245 = vmatprep.subr.mxu1 %v20_v2  ;;  %3062 = vmatprep.subr.mxu0 %v20_v2  ;;  %v30_v9 = vld [vmem:[%s4372_s0 + $0x8] sm:$0xff]  ;;  %v41_v10 = vld [vmem:[%s4372_s0 + $0x60] sm:$0xff]  ;;  %v43_v13 = vld [vmem:[%s4372_s0 + $0x70] sm:$0xff] }
   0x5   :  { %3247 = vmatpush3.msra.mxu1 %v20_v2  ;;  %3076 = vmatprep.mubr.msk.f32.mxu1 %vm49_vm1, %v37_v3  ;;  %v2853_v11 = vld [vmem:[%s4373_s2 + $0x20] sm:$0xff]  ;;  %v42_v12 = vld [vmem:[%s4372_s0 + $0x68] sm:$0xff]  ;;  %v44_v15 = vld [vmem:[%s4372_s0 + $0x78] sm:$0xff] }
   0x6   :  { %3077 = vmatmul.mubr.msk.f32.vlgmr.msra.gmra.mxu1 %vm49_vm1, %v38_v4  ;;  %3088 = vmatprep.subr.msk.mxu1 %vm265_vm2, %v3562_v1  ;;  %v2854_v14 = vld [vmem:[%s4373_s2 + $0x28] sm:$0xff]  ;;  %v247_v16 = vld [vmem:[%s4373_s2] sm:$0xff]  ;;  %v3673_v29 = vld [vmem:[%s4371_s1 + $0x15] ss:$0 sm:$0xff] }
   0x7   :  { %3089 = vmatpush3.msk.msra.mxu1 %vm265_vm2, %v3562_v1  ;;  %3079 = vmatprep.mubr.msk.f32.mxu1 %vm49_vm1, %v39_v5  ;;  %v248_v17 = vld [vmem:[%s4373_s2 + $0x8] sm:$0xff]  ;;  %v31_v60 = vld [vmem:[%s4372_s0 + $0x10] sm:$0xff]  ;;  %v32_v61 = vld [vmem:[%s4372_s0 + $0x18] sm:$0xff] }
   0x8   :  { %3090 = vmatprep.subr.mxu1 %v3579_v6  ;;  %3063 = vmatpush3.msra.mxu0 %v20_v2  ;;  %v3647_v18 = vld [vmem:[%s4371_s1 + $0x26] sm:$0xff]  ;;  %v2851_v2 = vld [vmem:[%s4373_s2 + $0x10] sm:$0xff]  ;;  %v2852_v4 = vld [vmem:[%s4373_s2 + $0x18] sm:$0xff] }
   0x9   :  { %3091 = vmatpush3.msra.mxu1 %v3579_v6  ;;  %3064 = vmatprep.mubr.msk.f32.mxu0 %vm49_vm1, %v29_v7  ;;  %v3711_v7 = vld [vmem:[%s4371_s1 + $0x1e] sm:$0xff] }
   0xa   :  { %3080 = vmatmul.mubr.msk.f32.gmra.mxu1 %vm49_vm1, %v40_v8  ;;  %3065 = vmatmul.mubr.msk.f32.vlgmr.msra.gmra.mxu0 %vm49_vm1, %v30_v9 }
   0xb   :  { %3082 = vmatprep.mubr.msk.f32.mxu1 %vm49_vm1, %v41_v10  ;;  %362 = vrot.lane.b32.xlu1 %v2853_v11, %s3516_s23  ;;  %v3718_v11 = vld [vmem:[%s4371_s1 + $0x16] sm:$0xff] }
   0xc   :  { %3095 = vmatprep.subr.msk.mxu1 %vm265_vm2, %v3562_v1  ;;  %3143 = vmatprep.subr.msk.mxu0 %vm265_vm2, %v3562_v1 }
   0xd   :  { %3144 = vmatpush3.msk.msra.mxu0 %vm265_vm2, %v3562_v1  ;;  %3067 = vmatprep.mubr.msk.f32.mxu0 %vm49_vm1, %v31_v60 }
   0xe   :  { %3083 = vmatmul.mubr.msk.f32.gmra.mxu1 %vm49_vm1, %v42_v12  ;;  %3145 = vmatprep.subr.mxu0 %v3579_v6 }
   0xf   :  { %3085 = vmatprep.mubr.msk.f32.mxu1 %vm49_vm1, %v43_v13  ;;  %364 = vrot.lane.b32.xlu1 %v2854_v14, %s3516_s23 }
  0x10   :  { %3146 = vmatpush3.msra.mxu0 %v3579_v6 }
  0x11   :  { %3159 = vmatprep.subr.msk.mxu0 %vm265_vm2, %v3562_v1  ;;  %3068 = vmatmul.mubr.msk.f32.gmra.mxu0 %vm49_vm1, %v32_v61 }
  0x12   :  { %3086 = vmatmul.mubr.msk.f32.gmra.mxu1 %vm49_vm1, %v44_v15 }
  0x13   :  { %3092 = vmatprep.mubr.msk.f32.mxu1 %vm258_vm3, %v247_v16 }
  0x16   :  { %3093 = vmatmul.mubr.msk.f32.vlgmr.msra.gmra.mxu1 %vm258_vm3, %v248_v17 }
  0x17   :  { %3096 = vmatpush3.msk.msra.mxu1 %vm265_vm2, %v3562_v1 }
  0x18   :  { %3097 = vmatprep.subr.mxu1 %v3579_v6 }
  0x19   :  { %3098 = vmatpush3.msra.mxu1 %v3579_v6 }
  0x1a   :  { %3102 = vmatprep.subr.mxu1 %v3647_v18 }
  0x7d   :  { %v363_v50 = vpop.permute.xlu1 %362 }
  0x81   :  { %v365_v52 = vpop.permute.xlu1 %364 }
  0xc6   :  { %v3654_v19 = vpop.f32.mrf.mxu1 }
  0xc8   :  { %v3656_v20 = vpop.f32.mrf.mxu1 }
  0xca   :  { %v3658_v21 = vpop.f32.mrf.mxu1  ;;  %v3066_v25 = vpop.f32.mrf.mxu0 }
  0xcb   :  { %v174_v32 = vadd.f32 %v3066_v25, %v3673_v29 }
  0xcc   :  { %v3660_v22 = vpop.f32.mrf.mxu1  ;;  %v168_v28 = vpop.f32.mrf.mxu0 }
  0xcd   :  { %v169_v31 = vadd.f32 %v3673_v29, %v168_v28 }
  0xce   :  { %v3662_v23 = vpop.f32.mrf.mxu1 }
  0xd0   :  { %v3664_v24 = vpop.f32.mrf.mxu1 }
  0xd1   :  { %v3069_v14 = vpop.f32.mrf.mxu0 }
  0xd2   :  { %v3666_v26 = vpop.f32.mrf.mxu1  ;;  %v184_v16 = vadd.f32 %v3069_v14, %v3673_v29 }
  0xd3   :  { %v178_v15 = vpop.f32.mrf.mxu0 }
  0xd4   :  { %v3668_v27 = vpop.f32.mrf.mxu1  ;;  %v179_v17 = vadd.f32 %v3673_v29, %v178_v15 }
  0xd6   :  { %v3094_v30 = vpop.f32.mrf.mxu1 }
  0xd7   :  { %v345_v35 = vadd.f32 %v3094_v30, %v174_v32  ;;  %v3740_v32 = vld [vmem:[%s4371_s1 + $0x2e] ss:$0 sm:$0xff] }
  0xd8   :  { %v335_v33 = vpop.f32.mrf.mxu1 }
  0xd9   :  { %v344_v34 = vadd.f32 %v335_v33, %v169_v31  ;;  %v2861_v39 = vmul.f32 -1.442695, %v345_v35 }
  0xdb   :  { %3253 = vtanh.f32 %v344_v34  ;;  %v2860_v38 = vmul.f32 -1.442695, %v344_v34 }
  0xdc   :  { %3255 = vtanh.f32 %v345_v35 }
  0xdd   :  { %3257 = vpow2.f32 %v2860_v38 }
  0xde   :  { %3259 = vpow2.f32 %v2861_v39 }
  0xe8   :  { %v3254_v36 = vpop.eup %3253 }
  0xe9   :  { %372 = vrot.lane.b32.xlu0 %v3254_v36, %s3517_s14  ;;  %v3256_v37 = vpop.eup %3255 }
  0xea   :  { %v3258_v40 = vpop.eup %3257 }
  0xeb   :  { %v352_v41 = vadd.f32 1.0, %v3258_v40  ;;  %v3260_v42 = vpop.eup %3259  ;;  %v2856_v40 = vld [vmem:[%s4373_s2 + $0x38] sm:$0xff] }
  0xec   :  { %v353_v43 = vadd.f32 1.0, %v3260_v42  ;;  %v2855_v42 = vld [vmem:[%s4373_s2 + $0x30] sm:$0xff] }
  0xed   :  { %374 = vrot.lane.b32.xlu0 %v3256_v37, %s3517_s14  ;;  %3261 = vrcp.f32 %v352_v41 }
  0xee   :  { %3263 = vrcp.f32 %v353_v43 }
  0xfa   :  { %v3262_v44 = vpop.eup %3261 }
  0xfb   :  { %v3264_v47 = vpop.eup %3263  ;;  %v368_v51 = vmul.f32 %v3262_v44, %v363_v50 }
  0xfc   :  { %v369_v55 = vmul.f32 %v3264_v47, %v365_v52 }
 0x15b   :  { %v373_v45 = vpop.permute.xlu0 %372 }
 0x15c   :  { %v378_v46 = vmul.f32 %v3262_v44, %v373_v45 }
 0x15e   :  { %382 = vrot.lane.b32.xlu0 %v378_v46, %s3516_s23 }
 0x15f   :  { %v375_v48 = vpop.permute.xlu0 %374 }
 0x160   :  { %v379_v49 = vmul.f32 %v3264_v47, %v375_v48 }
 0x162   :  { %384 = vrot.lane.b32.xlu1 %v379_v49, %s3516_s23 }
 0x1d0   :  { %v383_v53 = vpop.permute.xlu0 %382 }
 0x1d1   :  { %v3681_v54 = vadd.f32 %v383_v53, %v368_v51 }
 0x1d3   :  { %3265 = vtanh.f32 %v3681_v54 }
 0x1d4   :  { %v385_v56 = vpop.permute.xlu1 %384 }
 0x1d5   :  { %v3684_v57 = vadd.f32 %v385_v56, %v369_v55 }
 0x1d7   :  { %3267 = vtanh.f32 %v3684_v57 }
 0x1e0   :  { %v3266_v58 = vpop.eup %3265 }
 0x1e1   :  { %394 = vrot.lane.b32.xlu0 %v3266_v58, %s3518_s15 }
 0x1e4   :  { %v3268_v59 = vpop.eup %3267 }
 0x1e5   :  { %396 = vrot.lane.b32.xlu1 %v3268_v59, %s3518_s15 }
 0x253   :  { %v395_v62 = vpop.permute.xlu0 %394 }
 0x254   :  { %v400_v63 = vmul.f32 %v3262_v44, %v395_v62 }
 0x256   :  { %404 = vrot.lane.b32.xlu0 %v400_v63, %s3519_s20 }
 0x257   :  { %v397_v0 = vpop.permute.xlu1 %396 }
 0x258   :  { %v401_v3 = vmul.f32 %v3264_v47, %v397_v0 }
 0x25a   :  { %406 = vrot.lane.b32.xlu1 %v401_v3, %s3519_s20  ;;  %541 = vrot.lane.b32.xlu0 %v2851_v2, %s3516_s23 }
 0x25e   :  { %543 = vrot.lane.b32.xlu1 %v2852_v4, %s3516_s23 }
 0x2c8   :  { %v405_v5 = vpop.permute.xlu0 %404 }
 0x2c9   :  { %3099 = vmatprep.mubr.msk.f32.mxu1 %vm258_vm3, %v405_v5 }
 0x2cc   :  { %v407_v8 = vpop.permute.xlu1 %406  ;;  %v542_v9 = vpop.permute.xlu0 %541 }
 0x2cd   :  { %v547_v10 = vsel %vm258_vm3, %v405_v5, %v542_v9  ;;  %3100 = vmatmul.mubr.msk.f32.vlgmr.msra.gmra.mxu1 %vm258_vm3, %v407_v8 }
 0x2ce   :  { %3103 = vmatpush3.msra.mxu1 %v3647_v18  ;;  %3108 = vmatprep.mubr.msk.f32.mxu1 %vm553_vm4, %v547_v10 }
 0x2cf   :  { %3104 = vmatprep.subr.mxu1 %v3711_v7 }
 0x2d0   :  { %3105 = vmatpush3.msra.mxu1 %v3711_v7  ;;  %v544_v12 = vpop.permute.xlu1 %543 }
 0x2d1   :  { %v548_v13 = vsel %vm258_vm3, %v407_v8, %v544_v12  ;;  %3106 = vmatprep.subr.mxu1 %v3718_v11 }
 0x2d2   :  { %3107 = vmatpush3.msra.mxu1 %v3718_v11 }
 0x2d3   :  { %3109 = vmatmul.mubr.msk.f32.vlgmr.msra.gmra.mxu1 %vm553_vm4, %v548_v13  ;;  %3111 = vmatprep.subr.msk.mxu1 %vm265_vm2, %v3562_v1 }
 0x2d4   :  { %3112 = vmatpush3.msk.msra.mxu1 %vm265_vm2, %v3562_v1 }
 0x2d5   :  { %3113 = vmatprep.subr.mxu1 %v3579_v6 }
 0x2d6   :  { %3114 = vmatpush3.msra.mxu1 %v3579_v6 }
 0x2d7   :  { %3118 = vmatprep.subr.mxu1 %v3647_v18 }
 0x38d   :  { %v3101_v25 = vpop.f32.mrf.mxu1 }
 0x38e   :  { %v488_v28 = vadd.f32 %v3101_v25, %v184_v16 }
 0x38f   :  { %v478_v30 = vpop.f32.mrf.mxu1 }
 0x390   :  { %3269 = vtanh.f32 %v488_v28  ;;  %v487_v31 = vadd.f32 %v478_v30, %v179_v17  ;;  %v2866_v43 = vmul.f32 -1.442695, %v488_v28 }
 0x392   :  { %3271 = vtanh.f32 %v487_v31  ;;  %v2865_v44 = vmul.f32 -1.442695, %v487_v31 }
 0x393   :  { %v3110_v33 = vpop.f32.mrf.mxu1 }
 0x394   :  { %v632_v34 = vadd.f32 %v3110_v33, %v3740_v32 }
 0x395   :  { %v626_v35 = vpop.f32.mrf.mxu1 }
 0x396   :  { %3273 = vtanh.f32 %v632_v34  ;;  %v627_v36 = vadd.f32 %v3740_v32, %v626_v35  ;;  %v2871_v45 = vmul.f32 -1.442695, %v632_v34 }
 0x398   :  { %3275 = vtanh.f32 %v627_v36  ;;  %v2870_v46 = vmul.f32 -1.442695, %v627_v36  ;;  %v33_v36 = vld [vmem:[%s4372_s0 + $0x20] sm:$0xff] }
 0x399   :  { %3277 = vpow2.f32 %v2866_v43  ;;  %3070 = vmatprep.mubr.msk.f32.mxu0 %vm49_vm1, %v33_v36 }
 0x39a   :  { %3279 = vpow2.f32 %v2865_v44 }
 0x39b   :  { %3281 = vpow2.f32 %v2871_v45 }
 0x39c   :  { %3283 = vpow2.f32 %v2870_v46 }
 0x39d   :  { %v3270_v37 = vpop.eup %3269 }
 0x39e   :  { %509 = vrot.lane.b32.xlu1 %v3270_v37, %s3517_s14  ;;  %v34_v37 = vld [vmem:[%s4372_s0 + $0x28] sm:$0xff] }
 0x39f   :  { %v3272_v38 = vpop.eup %3271  ;;  %3071 = vmatmul.mubr.msk.f32.gmra.mxu0 %vm49_vm1, %v34_v37 }
 0x3a0   :  { %507 = vrot.lane.b32.xlu0 %v3272_v38, %s3517_s14 }
 0x3a3   :  { %v3274_v39 = vpop.eup %3273 }
 0x3a4   :  { %663 = vrot.lane.b32.xlu1 %v3274_v39, %s3517_s14 }
 0x3a5   :  { %v3276_v41 = vpop.eup %3275 }
 0x3a6   :  { %661 = vrot.lane.b32.xlu0 %v3276_v41, %s3517_s14  ;;  %v3278_v47 = vpop.eup %3277 }
 0x3a7   :  { %v3280_v48 = vpop.eup %3279  ;;  %v496_v49 = vadd.f32 1.0, %v3278_v47 }
 0x3a8   :  { %653 = vrot.lane.b32.xlu1 %v2856_v40, %s3516_s23  ;;  %v3282_v50 = vpop.eup %3281  ;;  %v495_v51 = vadd.f32 1.0, %v3280_v48 }
 0x3a9   :  { %3285 = vrcp.f32 %v496_v49  ;;  %v3284_v52 = vpop.eup %3283  ;;  %v642_v53 = vadd.f32 1.0, %v3282_v50 }
 0x3aa   :  { %651 = vrot.lane.b32.xlu0 %v2855_v42, %s3516_s23  ;;  %3287 = vrcp.f32 %v495_v51  ;;  %v641_v55 = vadd.f32 1.0, %v3284_v52 }
 0x3ab   :  { %3289 = vrcp.f32 %v642_v53 }
 0x3ac   :  { %3291 = vrcp.f32 %v641_v55 }
 0x3b6   :  { %v3286_v56 = vpop.eup %3285 }
 0x3b7   :  { %v3288_v60 = vpop.eup %3287  ;;  %v504_v10 = vmul.f32 %v3286_v56, %v3684_v57 }
 0x3b8   :  { %v3290_v63 = vpop.eup %3289  ;;  %v503_v14 = vmul.f32 %v3288_v60, %v3681_v54 }
 0x3b9   :  { %v3292_v3 = vpop.eup %3291 }
 0x410   :  { %v510_v58 = vpop.permute.xlu1 %509 }
 0x411   :  { %v514_v59 = vmul.f32 %v3286_v56, %v510_v58 }
 0x412   :  { %v508_v61 = vpop.permute.xlu0 %507 }
 0x413   :  { %519 = vrot.lane.b32.xlu1 %v514_v59, %s3516_s23  ;;  %v513_v62 = vmul.f32 %v3288_v60, %v508_v61 }
 0x415   :  { %517 = vrot.lane.b32.xlu0 %v513_v62, %s3516_s23 }
 0x416   :  { %v664_v0 = vpop.permute.xlu1 %663 }
 0x417   :  { %v668_v2 = vmul.f32 %v3290_v63, %v664_v0 }
 0x418   :  { %v662_v4 = vpop.permute.xlu0 %661 }
 0x419   :  { %673 = vrot.lane.b32.xlu1 %v668_v2, %s3516_s23  ;;  %v667_v5 = vmul.f32 %v3292_v3, %v662_v4 }
 0x41a   :  { %v654_v8 = vpop.permute.xlu1 %653 }
 0x41b   :  { %671 = vrot.lane.b32.xlu0 %v667_v5, %s3516_s23  ;;  %v658_v17 = vmul.f32 %v3290_v63, %v654_v8 }
 0x41c   :  { %v652_v9 = vpop.permute.xlu0 %651 }
 0x41d   :  { %v657_v30 = vmul.f32 %v3292_v3, %v652_v9 }
 0x45f   :  { %v3072_v52 = vpop.f32.mrf.mxu0 }
 0x460   :  { %v194_v55 = vadd.f32 %v3072_v52, %v3673_v29 }
 0x461   :  { %v188_v53 = vpop.f32.mrf.mxu0 }
 0x485   :  { %v520_v12 = vpop.permute.xlu1 %519 }
 0x486   :  { %v3761_v13 = vadd.f32 %v520_v12, %v504_v10 }
 0x487   :  { %v518_v15 = vpop.permute.xlu0 %517 }
 0x488   :  { %3293 = vtanh.f32 %v3761_v13  ;;  %v3765_v16 = vadd.f32 %v518_v15, %v503_v14 }
 0x48a   :  { %3295 = vtanh.f32 %v3765_v16 }
 0x48b   :  { %v674_v25 = vpop.permute.xlu1 %673 }
 0x48c   :  { %v3768_v28 = vadd.f32 %v674_v25, %v658_v17 }
 0x48d   :  { %v672_v57 = vpop.permute.xlu0 %671 }
 0x48e   :  { %3297 = vtanh.f32 %v3768_v28  ;;  %v3771_v31 = vadd.f32 %v672_v57, %v657_v30 }
 0x490   :  { %3299 = vtanh.f32 %v3771_v31 }
 0x495   :  { %v3294_v54 = vpop.eup %3293 }
 0x496   :  { %531 = vrot.lane.b32.xlu1 %v3294_v54, %s3518_s15 }
 0x497   :  { %v3296_v33 = vpop.eup %3295 }
 0x498   :  { %529 = vrot.lane.b32.xlu0 %v3296_v33, %s3518_s15 }
 0x49b   :  { %v3298_v34 = vpop.eup %3297 }
 0x49c   :  { %685 = vrot.lane.b32.xlu1 %v3298_v34, %s3518_s15 }
 0x49d   :  { %v3300_v35 = vpop.eup %3299 }
 0x49e   :  { %683 = vrot.lane.b32.xlu0 %v3300_v35, %s3518_s15 }
 0x508   :  { %v532_v38 = vpop.permute.xlu1 %531 }
 0x509   :  { %v536_v39 = vmul.f32 %v3286_v56, %v532_v38  ;;  %v189_v56 = vadd.f32 %v3673_v29, %v188_v53 }
 0x50a   :  { %v530_v40 = vpop.permute.xlu0 %529 }
 0x50b   :  { %705 = vrot.lane.b32.xlu1 %v536_v39, %s3519_s20  ;;  %v535_v41 = vmul.f32 %v3288_v60, %v530_v40 }
 0x50d   :  { %703 = vrot.lane.b32.xlu0 %v535_v41, %s3519_s20 }
 0x50e   :  { %v686_v42 = vpop.permute.xlu1 %685 }
 0x50f   :  { %v3788_v43 = vmul.f32 %v3290_v63, %v686_v42 }
 0x510   :  { %v684_v44 = vpop.permute.xlu0 %683 }
 0x511   :  { %840 = vrot.lane.b32.xlu1 %v3788_v43, %s3517_s14  ;;  %v3792_v45 = vmul.f32 %v3292_v3, %v684_v44 }
 0x513   :  { %838 = vrot.lane.b32.xlu0 %v3792_v45, %s3517_s14 }
 0x57d   :  { %v706_v46 = vpop.permute.xlu1 %705 }
 0x57f   :  { %v704_v47 = vpop.permute.xlu0 %703 }
 0x580   :  { %3115 = vmatprep.mubr.msk.f32.mxu1 %vm258_vm3, %v704_v47 }
 0x581   :  { %3116 = vmatmul.mubr.msk.f32.vlgmr.msra.gmra.mxu1 %vm258_vm3, %v706_v46 }
 0x582   :  { %3119 = vmatpush3.msra.mxu1 %v3647_v18 }
 0x583   :  { %3120 = vmatprep.subr.mxu1 %v3711_v7  ;;  %v841_v48 = vpop.permute.xlu1 %840 }
 0x584   :  { %3121 = vmatpush3.msra.mxu1 %v3711_v7  ;;  %v845_v51 = vsel %vm258_vm3, %v706_v46, %v841_v48 }
 0x585   :  { %v839_v49 = vpop.permute.xlu0 %838  ;;  %3122 = vmatprep.subr.mxu1 %v3718_v11 }
 0x586   :  { %v844_v50 = vsel %vm258_vm3, %v704_v47, %v839_v49  ;;  %3123 = vmatpush3.msra.mxu1 %v3718_v11 }
 0x587   :  { %3124 = vmatprep.mubr.msk.f32.mxu1 %vm553_vm4, %v844_v50  ;;  %3127 = vmatprep.subr.msk.mxu1 %vm265_vm2, %v3562_v1 }
 0x588   :  { %3125 = vmatmul.mubr.msk.f32.vlgmr.msra.gmra.mxu1 %vm553_vm4, %v845_v51 }
 0x589   :  { %3128 = vmatpush3.msk.msra.mxu1 %vm265_vm2, %v3562_v1 }
 0x58a   :  { %3129 = vmatprep.subr.mxu1 %v3579_v6 }
 0x58b   :  { %3130 = vmatpush3.msra.mxu1 %v3579_v6 }
 0x58c   :  { %3134 = vmatprep.subr.mxu1 %v3647_v18 }
 0x641   :  { %v3117_v58 = vpop.f32.mrf.mxu1 }
 0x642   :  { %v787_v59 = vadd.f32 %v3117_v58, %v194_v55 }
 0x643   :  { %v777_v60 = vpop.f32.mrf.mxu1 }
 0x644   :  { %3301 = vtanh.f32 %v787_v59  ;;  %v786_v61 = vadd.f32 %v777_v60, %v189_v56  ;;  %v2876_v9 = vmul.f32 -1.442695, %v787_v59 }
 0x646   :  { %3303 = vtanh.f32 %v786_v61  ;;  %v2875_v10 = vmul.f32 -1.442695, %v786_v61 }
 0x648   :  { %v3126_v62 = vpop.f32.mrf.mxu1 }
 0x649   :  { %v924_v63 = vadd.f32 %v3126_v62, %v3740_v32 }
 0x64a   :  { %v918_v0 = vpop.f32.mrf.mxu1 }
 0x64b   :  { %3305 = vtanh.f32 %v924_v63  ;;  %v919_v2 = vadd.f32 %v3740_v32, %v918_v0  ;;  %v2880_v12 = vmul.f32 -1.442695, %v924_v63  ;;  %v36_v0 = vld [vmem:[%s4372_s0 + $0x38] sm:$0xff] }
 0x64d   :  { %3307 = vtanh.f32 %v919_v2  ;;  %v2879_v14 = vmul.f32 -1.442695, %v919_v2 }
 0x64e   :  { %3309 = vpow2.f32 %v2876_v9 }
 0x64f   :  { %3311 = vpow2.f32 %v2875_v10 }
 0x650   :  { %3313 = vpow2.f32 %v2880_v12 }
 0x651   :  { %v3302_v3 = vpop.eup %3301  ;;  %3315 = vpow2.f32 %v2879_v14 }
 0x652   :  { %808 = vrot.lane.b32.xlu1 %v3302_v3, %s3517_s14 }
 0x653   :  { %v3304_v4 = vpop.eup %3303 }
 0x654   :  { %806 = vrot.lane.b32.xlu0 %v3304_v4, %s3517_s14 }
 0x658   :  { %v3306_v5 = vpop.eup %3305 }
 0x659   :  { %947 = vrot.lane.b32.xlu1 %v3306_v5, %s3517_s14 }
 0x65a   :  { %v3308_v8 = vpop.eup %3307 }
 0x65b   :  { %945 = vrot.lane.b32.xlu0 %v3308_v8, %s3517_s14  ;;  %v3310_v15 = vpop.eup %3309 }
 0x65c   :  { %v3312_v17 = vpop.eup %3311  ;;  %v795_v25 = vadd.f32 1.0, %v3310_v15 }
 0x65d   :  { %v794_v30 = vadd.f32 1.0, %v3312_v17  ;;  %v3314_v57 = vpop.eup %3313 }
 0x65e   :  { %3317 = vrcp.f32 %v795_v25  ;;  %v3316_v54 = vpop.eup %3315  ;;  %v934_v33 = vadd.f32 1.0, %v3314_v57 }
 0x65f   :  { %3319 = vrcp.f32 %v794_v30  ;;  %v933_v34 = vadd.f32 1.0, %v3316_v54 }
 0x660   :  { %3321 = vrcp.f32 %v934_v33 }
 0x661   :  { %3323 = vrcp.f32 %v933_v34 }
 0x66b   :  { %v3318_v35 = vpop.eup %3317 }
 0x66c   :  { %v3320_v38 = vpop.eup %3319  ;;  %v803_v49 = vmul.f32 %v3318_v35, %v3761_v13 }
 0x66d   :  { %v3322_v41 = vpop.eup %3321  ;;  %v802_v52 = vmul.f32 %v3320_v38, %v3765_v16 }
 0x66e   :  { %v3324_v46 = vpop.eup %3323  ;;  %v942_v56 = vmul.f32 %v3322_v41, %v3768_v28 }
 0x66f   :  { %v941_v60 = vmul.f32 %v3324_v46, %v3771_v31  ;;  %v35_v31 = vld [vmem:[%s4372_s0 + $0x30] sm:$0xff] }
 0x670   :  { %3073 = vmatprep.mubr.msk.f32.mxu0 %vm49_vm1, %v35_v31 }
 0x671   :  { %3074 = vmatmul.mubr.msk.f32.gmra.mxu0 %vm49_vm1, %v36_v0 }
 0x6c4   :  { %v809_v36 = vpop.permute.xlu1 %808 }
 0x6c5   :  { %v813_v37 = vmul.f32 %v3318_v35, %v809_v36 }
 0x6c6   :  { %v807_v39 = vpop.permute.xlu0 %806 }
 0x6c7   :  { %818 = vrot.lane.b32.xlu1 %v813_v37, %s3516_s23  ;;  %v812_v40 = vmul.f32 %v3320_v38, %v807_v39 }
 0x6c9   :  { %816 = vrot.lane.b32.xlu0 %v812_v40, %s3516_s23 }
 0x6cb   :  { %v948_v42 = vpop.permute.xlu1 %947 }
 0x6cc   :  { %v952_v44 = vmul.f32 %v3322_v41, %v948_v42 }
 0x6cd   :  { %v946_v47 = vpop.permute.xlu0 %945 }
 0x6ce   :  { %957 = vrot.lane.b32.xlu1 %v952_v44, %s3516_s23  ;;  %v951_v48 = vmul.f32 %v3324_v46, %v946_v47 }
 0x6d0   :  { %955 = vrot.lane.b32.xlu0 %v951_v48, %s3516_s23 }
 0x731   :  { %v3075_v54 = vpop.f32.mrf.mxu0 }
 0x732   :  { %v204_v34 = vadd.f32 %v3075_v54, %v3673_v29 }
 0x733   :  { %v198_v33 = vpop.f32.mrf.mxu0 }
 0x739   :  { %v819_v50 = vpop.permute.xlu1 %818 }
 0x73a   :  { %v3827_v51 = vadd.f32 %v819_v50, %v803_v49 }
 0x73b   :  { %v817_v53 = vpop.permute.xlu0 %816 }
 0x73c   :  { %3325 = vtanh.f32 %v3827_v51  ;;  %v3831_v55 = vadd.f32 %v817_v53, %v802_v52 }
 0x73e   :  { %3327 = vtanh.f32 %v3831_v55 }
 0x740   :  { %v958_v58 = vpop.permute.xlu1 %957 }
 0x741   :  { %v3835_v59 = vadd.f32 %v958_v58, %v942_v56 }
 0x742   :  { %v956_v13 = vpop.permute.xlu0 %955 }
 0x743   :  { %3329 = vtanh.f32 %v3835_v59  ;;  %v3839_v61 = vadd.f32 %v956_v13, %v941_v60 }
 0x745   :  { %3331 = vtanh.f32 %v3839_v61 }
 0x749   :  { %v3326_v16 = vpop.eup %3325 }
 0x74a   :  { %830 = vrot.lane.b32.xlu1 %v3326_v16, %s3518_s15 }
 0x74b   :  { %v3328_v62 = vpop.eup %3327 }
 0x74c   :  { %828 = vrot.lane.b32.xlu0 %v3328_v62, %s3518_s15 }
 0x750   :  { %v3330_v63 = vpop.eup %3329 }
 0x751   :  { %969 = vrot.lane.b32.xlu1 %v3330_v63, %s3518_s15 }
 0x752   :  { %v3332_v28 = vpop.eup %3331 }
 0x753   :  { %967 = vrot.lane.b32.xlu0 %v3332_v28, %s3518_s15 }
 0x7bc   :  { %v831_v2 = vpop.permute.xlu1 %830 }
 0x7bd   :  { %v835_v3 = vmul.f32 %v3318_v35, %v831_v2  ;;  %v199_v35 = vadd.f32 %v3673_v29, %v198_v33 }
 0x7be   :  { %v829_v4 = vpop.permute.xlu0 %828 }
 0x7bf   :  { %989 = vrot.lane.b32.xlu1 %v835_v3, %s3519_s20  ;;  %v834_v5 = vmul.f32 %v3320_v38, %v829_v4 }
 0x7c1   :  { %987 = vrot.lane.b32.xlu0 %v834_v5, %s3519_s20 }
 0x7c3   :  { %v970_v8 = vpop.permute.xlu1 %969 }
 0x7c4   :  { %v3856_v9 = vmul.f32 %v3322_v41, %v970_v8 }
 0x7c5   :  { %v968_v10 = vpop.permute.xlu0 %967 }
 0x7c6   :  { %1124 = vrot.lane.b32.xlu1 %v3856_v9, %s3517_s14  ;;  %v3860_v12 = vmul.f32 %v3324_v46, %v968_v10 }
 0x7c8   :  { %1122 = vrot.lane.b32.xlu0 %v3860_v12, %s3517_s14 }
 0x831   :  { %v990_v15 = vpop.permute.xlu1 %989 }
 0x833   :  { %v988_v14 = vpop.permute.xlu0 %987 }
 0x834   :  { %3131 = vmatprep.mubr.msk.f32.mxu1 %vm258_vm3, %v988_v14 }
 0x835   :  { %3132 = vmatmul.mubr.msk.f32.vlgmr.msra.gmra.mxu1 %vm258_vm3, %v990_v15 }
 0x836   :  { %3135 = vmatpush3.msra.mxu1 %v3647_v18 }
 0x837   :  { %3136 = vmatprep.subr.mxu1 %v3711_v7 }
 0x838   :  { %3137 = vmatpush3.msra.mxu1 %v3711_v7  ;;  %v1125_v17 = vpop.permute.xlu1 %1124 }
 0x839   :  { %3138 = vmatprep.subr.mxu1 %v3718_v11  ;;  %v1129_v57 = vsel %vm258_vm3, %v990_v15, %v1125_v17 }
 0x83a   :  { %v1123_v25 = vpop.permute.xlu0 %1122  ;;  %3139 = vmatpush3.msra.mxu1 %v3718_v11 }
 0x83b   :  { %v1128_v30 = vsel %vm258_vm3, %v988_v14, %v1123_v25  ;;  %3150 = vmatprep.subr.mxu1 %v3647_v18 }
 0x83c   :  { %3140 = vmatprep.mubr.msk.f32.mxu1 %vm553_vm4, %v1128_v30 }
 0x83d   :  { %3141 = vmatmul.mubr.msk.f32.vlgmr.msra.gmra.mxu1 %vm553_vm4, %v1129_v57 }
 0x83e   :  { %3151 = vmatpush3.msra.mxu1 %v3647_v18 }
 0x83f   :  { %3152 = vmatprep.subr.mxu1 %v3711_v7 }
 0x840   :  { %3153 = vmatpush3.msra.mxu1 %v3711_v7 }
 0x841   :  { %3154 = vmatprep.subr.mxu1 %v3718_v11 }
 0x842   :  { %3155 = vmatpush3.msra.mxu1 %v3718_v11 }
 0x843   :  { %3175 = vmatprep.subr.msk.mxu1 %vm265_vm2, %v3562_v1 }
 0x8f5   :  { %v3133_v36 = vpop.f32.mrf.mxu1 }
 0x8f6   :  { %v1071_v37 = vadd.f32 %v3133_v36, %v204_v34 }
 0x8f7   :  { %v1061_v38 = vpop.f32.mrf.mxu1 }
 0x8f8   :  { %3333 = vtanh.f32 %v1071_v37  ;;  %v1070_v39 = vadd.f32 %v1061_v38, %v199_v35  ;;  %v2885_v50 = vmul.f32 -1.442695, %v1071_v37 }
 0x8fa   :  { %3335 = vtanh.f32 %v1070_v39  ;;  %v2884_v52 = vmul.f32 -1.442695, %v1070_v39 }
 0x8fd   :  { %v3142_v40 = vpop.f32.mrf.mxu1 }
 0x8fe   :  { %v1208_v41 = vadd.f32 %v3142_v40, %v3740_v32 }
 0x8ff   :  { %v1202_v42 = vpop.f32.mrf.mxu1 }
 0x900   :  { %3337 = vtanh.f32 %v1208_v41  ;;  %v1203_v44 = vadd.f32 %v3740_v32, %v1202_v42  ;;  %v2889_v53 = vmul.f32 -1.442695, %v1208_v41 }
 0x902   :  { %3339 = vtanh.f32 %v1203_v44  ;;  %v2888_v56 = vmul.f32 -1.442695, %v1203_v44 }
 0x903   :  { %3341 = vpow2.f32 %v2885_v50 }
 0x904   :  { %3343 = vpow2.f32 %v2884_v52 }
 0x905   :  { %v3334_v46 = vpop.eup %3333  ;;  %3345 = vpow2.f32 %v2889_v53 }
 0x906   :  { %1092 = vrot.lane.b32.xlu1 %v3334_v46, %s3517_s14  ;;  %3347 = vpow2.f32 %v2888_v56 }
 0x907   :  { %v3336_v47 = vpop.eup %3335 }
 0x908   :  { %1090 = vrot.lane.b32.xlu0 %v3336_v47, %s3517_s14 }
 0x90d   :  { %v3338_v48 = vpop.eup %3337 }
 0x90e   :  { %1231 = vrot.lane.b32.xlu1 %v3338_v48, %s3517_s14 }
 0x90f   :  { %v3340_v49 = vpop.eup %3339 }
 0x910   :  { %1229 = vrot.lane.b32.xlu0 %v3340_v49, %s3517_s14  ;;  %v3342_v58 = vpop.eup %3341 }
 0x911   :  { %v3344_v60 = vpop.eup %3343  ;;  %v1079_v13 = vadd.f32 1.0, %v3342_v58 }
 0x912   :  { %v1078_v16 = vadd.f32 1.0, %v3344_v60  ;;  %v3346_v62 = vpop.eup %3345 }
 0x913   :  { %3349 = vrcp.f32 %v1079_v13  ;;  %v3348_v63 = vpop.eup %3347  ;;  %v1218_v28 = vadd.f32 1.0, %v3346_v62 }
 0x914   :  { %3351 = vrcp.f32 %v1078_v16  ;;  %v1217_v31 = vadd.f32 1.0, %v3348_v63  ;;  %v214_v63 = vadd.f32 %v3654_v19, %v3673_v29 }
 0x915   :  { %3353 = vrcp.f32 %v1218_v28 }
 0x916   :  { %3355 = vrcp.f32 %v1217_v31  ;;  %v209_v31 = vadd.f32 %v3673_v29, %v3656_v20 }
 0x920   :  { %v3350_v0 = vpop.eup %3349 }
 0x921   :  { %v3352_v4 = vpop.eup %3351  ;;  %v1087_v57 = vmul.f32 %v3350_v0, %v3827_v51 }
 0x922   :  { %v3354_v10 = vpop.eup %3353  ;;  %v1086_v34 = vmul.f32 %v3352_v4, %v3831_v55 }
 0x923   :  { %v3356_v17 = vpop.eup %3355  ;;  %v1226_v37 = vmul.f32 %v3354_v10, %v3835_v59 }
 0x924   :  { %v1225_v40 = vmul.f32 %v3356_v17, %v3839_v61 }
 0x978   :  { %v1093_v2 = vpop.permute.xlu1 %1092 }
 0x979   :  { %v1097_v3 = vmul.f32 %v3350_v0, %v1093_v2 }
 0x97a   :  { %v1091_v5 = vpop.permute.xlu0 %1090 }
 0x97b   :  { %1102 = vrot.lane.b32.xlu1 %v1097_v3, %s3516_s23  ;;  %v1096_v8 = vmul.f32 %v3352_v4, %v1091_v5 }
 0x97d   :  { %1100 = vrot.lane.b32.xlu0 %v1096_v8, %s3516_s23 }
 0x980   :  { %v1232_v14 = vpop.permute.xlu1 %1231 }
 0x981   :  { %v1236_v15 = vmul.f32 %v3354_v10, %v1232_v14 }
 0x982   :  { %v1230_v25 = vpop.permute.xlu0 %1229 }
 0x983   :  { %1241 = vrot.lane.b32.xlu1 %v1236_v15, %s3516_s23  ;;  %v1235_v30 = vmul.f32 %v3356_v17, %v1230_v25 }
 0x985   :  { %1239 = vrot.lane.b32.xlu0 %v1235_v30, %s3516_s23 }
 0x9ed   :  { %v1103_v54 = vpop.permute.xlu1 %1102 }
 0x9ee   :  { %v3896_v33 = vadd.f32 %v1103_v54, %v1087_v57 }
 0x9ef   :  { %v1101_v35 = vpop.permute.xlu0 %1100 }
 0x9f0   :  { %3357 = vtanh.f32 %v3896_v33  ;;  %v3900_v36 = vadd.f32 %v1101_v35, %v1086_v34 }
 0x9f2   :  { %3359 = vtanh.f32 %v3900_v36 }
 0x9f5   :  { %v1242_v38 = vpop.permute.xlu1 %1241 }
 0x9f6   :  { %v3904_v39 = vadd.f32 %v1242_v38, %v1226_v37 }
 0x9f7   :  { %v1240_v51 = vpop.permute.xlu0 %1239 }
 0x9f8   :  { %3361 = vtanh.f32 %v3904_v39  ;;  %v3908_v41 = vadd.f32 %v1240_v51, %v1225_v40 }
 0x9fa   :  { %3363 = vtanh.f32 %v3908_v41 }
 0x9fd   :  { %v3358_v55 = vpop.eup %3357 }
 0x9fe   :  { %1114 = vrot.lane.b32.xlu1 %v3358_v55, %s3518_s15 }
 0x9ff   :  { %v3360_v42 = vpop.eup %3359 }
 0xa00   :  { %1112 = vrot.lane.b32.xlu0 %v3360_v42, %s3518_s15 }
 0xa05   :  { %v3362_v44 = vpop.eup %3361 }
 0xa06   :  { %1253 = vrot.lane.b32.xlu1 %v3362_v44, %s3518_s15 }
 0xa07   :  { %v3364_v59 = vpop.eup %3363 }
 0xa08   :  { %1251 = vrot.lane.b32.xlu0 %v3364_v59, %s3518_s15 }
 0xa70   :  { %v1115_v61 = vpop.permute.xlu1 %1114 }
 0xa71   :  { %v1119_v46 = vmul.f32 %v3350_v0, %v1115_v61 }
 0xa72   :  { %v1113_v47 = vpop.permute.xlu0 %1112 }
 0xa73   :  { %1273 = vrot.lane.b32.xlu1 %v1119_v46, %s3519_s20  ;;  %v1118_v48 = vmul.f32 %v3352_v4, %v1113_v47 }
 0xa75   :  { %1271 = vrot.lane.b32.xlu0 %v1118_v48, %s3519_s20 }
 0xa78   :  { %v1254_v49 = vpop.permute.xlu1 %1253 }
 0xa79   :  { %v3917_v50 = vmul.f32 %v3354_v10, %v1254_v49 }
 0xa7a   :  { %v1252_v52 = vpop.permute.xlu0 %1251 }
 0xa7b   :  { %1408 = vrot.lane.b32.xlu1 %v3917_v50, %s3517_s14  ;;  %v3921_v53 = vmul.f32 %v3356_v17, %v1252_v52 }
 0xa7d   :  { %1406 = vrot.lane.b32.xlu0 %v3921_v53, %s3517_s14 }
 0xae5   :  { %v1274_v58 = vpop.permute.xlu1 %1273 }
 0xae7   :  { %v1272_v56 = vpop.permute.xlu0 %1271 }
 0xae8   :  { %3147 = vmatprep.mubr.msk.f32.mxu0 %vm258_vm3, %v1272_v56 }
 0xae9   :  { %3148 = vmatmul.mubr.msk.f32.vlgmr.msra.gmra.mxu0 %vm258_vm3, %v1274_v58 }
 0xaea   :  { %3160 = vmatpush3.msk.msra.mxu0 %vm265_vm2, %v3562_v1 }
 0xaeb   :  { %3161 = vmatprep.subr.mxu0 %v3579_v6 }
 0xaec   :  { %3162 = vmatpush3.msra.mxu0 %v3579_v6 }
 0xaed   :  { %3166 = vmatprep.subr.mxu0 %v3647_v18  ;;  %v1409_v60 = vpop.permute.xlu1 %1408 }
 0xaee   :  { %v1413_v62 = vsel %vm258_vm3, %v1274_v58, %v1409_v60 }
 0xaef   :  { %v1407_v13 = vpop.permute.xlu0 %1406 }
 0xaf0   :  { %v1412_v16 = vsel %vm258_vm3, %v1272_v56, %v1407_v13 }
 0xaf1   :  { %3156 = vmatprep.mubr.msk.f32.mxu1 %vm553_vm4, %v1412_v16 }
 0xaf2   :  { %3157 = vmatmul.mubr.msk.f32.vlgmr.msra.gmra.mxu1 %vm553_vm4, %v1413_v62 }
 0xaf3   :  { %3176 = vmatpush3.msk.msra.mxu1 %vm265_vm2, %v3562_v1 }
 0xaf4   :  { %3177 = vmatprep.subr.mxu1 %v3579_v6 }
 0xaf5   :  { %3178 = vmatpush3.msra.mxu1 %v3579_v6 }
 0xaf6   :  { %3182 = vmatprep.subr.mxu1 %v3647_v18 }
 0xba9   :  { %v3149_v28 = vpop.f32.mrf.mxu0 }
 0xbaa   :  { %v1355_v0 = vadd.f32 %v3149_v28, %v214_v63 }
 0xbab   :  { %v1345_v2 = vpop.f32.mrf.mxu0 }
 0xbac   :  { %3365 = vtanh.f32 %v1355_v0  ;;  %v1354_v3 = vadd.f32 %v1345_v2, %v209_v31  ;;  %v2894_v8 = vmul.f32 -1.442695, %v1355_v0 }
 0xbae   :  { %3367 = vtanh.f32 %v1354_v3  ;;  %v2893_v10 = vmul.f32 -1.442695, %v1354_v3 }
 0xbb2   :  { %v3158_v4 = vpop.f32.mrf.mxu1 }
 0xbb3   :  { %v1492_v1 = vadd.f32 %v3158_v4, %v3740_v32 }
 0xbb4   :  { %v1486_v5 = vpop.f32.mrf.mxu1 }
 0xbb5   :  { %3369 = vtanh.f32 %v1492_v1  ;;  %v1487_v6 = vadd.f32 %v3740_v32, %v1486_v5  ;;  %v2898_v14 = vmul.f32 -1.442695, %v1492_v1 }
 0xbb7   :  { %3371 = vtanh.f32 %v1487_v6  ;;  %v2897_v15 = vmul.f32 -1.442695, %v1487_v6 }
 0xbb8   :  { %3373 = vpow2.f32 %v2894_v8 }
 0xbb9   :  { %v3366_v18 = vpop.eup %3365  ;;  %3375 = vpow2.f32 %v2893_v10  ;;  %v3990_v10 = vld [vmem:[%s4371_s1 + $0x26] sm:$0xff] }
 0xbba   :  { %1376 = vrot.lane.b32.xlu1 %v3366_v18, %s3517_s14  ;;  %3377 = vpow2.f32 %v2898_v14 }
 0xbbb   :  { %v3368_v19 = vpop.eup %3367  ;;  %3379 = vpow2.f32 %v2897_v15  ;;  %v3510_v15 = vld [vmem:[%s4371_s1 + $0x11] sm:$0xf] }
 0xbbc   :  { %1374 = vrot.lane.b32.xlu0 %v3368_v19, %s3517_s14 }
 0xbc2   :  { %v3370_v20 = vpop.eup %3369 }
 0xbc3   :  { %1515 = vrot.lane.b32.xlu1 %v3370_v20, %s3517_s14 }
 0xbc4   :  { %v3372_v29 = vpop.eup %3371 }
 0xbc5   :  { %1513 = vrot.lane.b32.xlu0 %v3372_v29, %s3517_s14  ;;  %v3374_v17 = vpop.eup %3373 }
 0xbc6   :  { %v3376_v25 = vpop.eup %3375  ;;  %v1363_v30 = vadd.f32 1.0, %v3374_v17 }
 0xbc7   :  { %v1362_v57 = vadd.f32 1.0, %v3376_v25  ;;  %v3378_v54 = vpop.eup %3377 }
 0xbc8   :  { %3381 = vrcp.f32 %v1363_v30  ;;  %v3380_v34 = vpop.eup %3379  ;;  %v1502_v35 = vadd.f32 1.0, %v3378_v54 }
 0xbc9   :  { %3383 = vrcp.f32 %v1362_v57  ;;  %v1501_v37 = vadd.f32 1.0, %v3380_v34 }
 0xbca   :  { %3385 = vrcp.f32 %v1502_v35 }
 0xbcb   :  { %3387 = vrcp.f32 %v1501_v37 }
 0xbd5   :  { %v3382_v38 = vpop.eup %3381 }
 0xbd6   :  { %v3384_v55 = vpop.eup %3383  ;;  %v1371_v52 = vmul.f32 %v3382_v38, %v3896_v33 }
 0xbd7   :  { %v3386_v59 = vpop.eup %3385  ;;  %v1370_v60 = vmul.f32 %v3384_v55, %v3900_v36 }
 0xbd8   :  { %v3388_v47 = vpop.eup %3387  ;;  %v1510_v62 = vmul.f32 %v3386_v59, %v3904_v39 }
 0xbd9   :  { %v1509_v31 = vmul.f32 %v3388_v47, %v3908_v41 }
 0xc2c   :  { %v1377_v40 = vpop.permute.xlu1 %1376 }
 0xc2d   :  { %v1381_v51 = vmul.f32 %v3382_v38, %v1377_v40 }
 0xc2e   :  { %v1375_v42 = vpop.permute.xlu0 %1374 }
 0xc2f   :  { %1386 = vrot.lane.b32.xlu1 %v1381_v51, %s3516_s23  ;;  %v1380_v44 = vmul.f32 %v3384_v55, %v1375_v42 }
 0xc31   :  { %1384 = vrot.lane.b32.xlu0 %v1380_v44, %s3516_s23 }
 0xc35   :  { %v1516_v61 = vpop.permute.xlu1 %1515 }
 0xc36   :  { %v1520_v46 = vmul.f32 %v3386_v59, %v1516_v61 }
 0xc37   :  { %v1514_v48 = vpop.permute.xlu0 %1513 }
 0xc38   :  { %1525 = vrot.lane.b32.xlu1 %v1520_v46, %s3516_s23  ;;  %v1519_v49 = vmul.f32 %v3388_v47, %v1514_v48 }
 0xc3a   :  { %1523 = vrot.lane.b32.xlu0 %v1519_v49, %s3516_s23 }
 0xca1   :  { %v1387_v56 = vpop.permute.xlu1 %1386 }
 0xca2   :  { %v3956_v58 = vadd.f32 %v1387_v56, %v1371_v52 }
 0xca3   :  { %v1385_v13 = vpop.permute.xlu0 %1384 }
 0xca4   :  { %3389 = vtanh.f32 %v3956_v58  ;;  %v3960_v16 = vadd.f32 %v1385_v13, %v1370_v60 }
 0xca6   :  { %3391 = vtanh.f32 %v3960_v16 }
 0xcaa   :  { %v1526_v63 = vpop.permute.xlu1 %1525 }
 0xcab   :  { %v3964_v28 = vadd.f32 %v1526_v63, %v1510_v62 }
 0xcac   :  { %v1524_v33 = vpop.permute.xlu0 %1523 }
 0xcad   :  { %3393 = vtanh.f32 %v3964_v28  ;;  %v3968_v0 = vadd.f32 %v1524_v33, %v1509_v31 }
 0xcaf   :  { %3395 = vtanh.f32 %v3968_v0 }
 0xcb1   :  { %v3390_v36 = vpop.eup %3389 }
 0xcb2   :  { %1398 = vrot.lane.b32.xlu1 %v3390_v36, %s3518_s15 }
 0xcb3   :  { %v3392_v2 = vpop.eup %3391 }
 0xcb4   :  { %1396 = vrot.lane.b32.xlu0 %v3392_v2, %s3518_s15 }
 0xcba   :  { %v3394_v3 = vpop.eup %3393 }
 0xcbb   :  { %1537 = vrot.lane.b32.xlu1 %v3394_v3, %s3518_s15 }
 0xcbc   :  { %v3396_v39 = vpop.eup %3395 }
 0xcbd   :  { %1535 = vrot.lane.b32.xlu0 %v3396_v39, %s3518_s15 }
 0xd24   :  { %v1399_v41 = vpop.permute.xlu1 %1398 }
 0xd25   :  { %v1403_v4 = vmul.f32 %v3382_v38, %v1399_v41 }
 0xd26   :  { %v1397_v1 = vpop.permute.xlu0 %1396 }
 0xd27   :  { %1557 = vrot.lane.b32.xlu1 %v1403_v4, %s3519_s20  ;;  %v1402_v5 = vmul.f32 %v3384_v55, %v1397_v1 }
 0xd29   :  { %1555 = vrot.lane.b32.xlu0 %v1402_v5, %s3519_s20 }
 0xd2d   :  { %v1538_v6 = vpop.permute.xlu1 %1537 }
 0xd2e   :  { %v3977_v18 = vmul.f32 %v3386_v59, %v1538_v6 }
 0xd2f   :  { %v1536_v19 = vpop.permute.xlu0 %1535 }
 0xd30   :  { %1692 = vrot.lane.b32.xlu1 %v3977_v18, %s3517_s14  ;;  %v3981_v20 = vmul.f32 %v3388_v47, %v1536_v19 }
 0xd32   :  { %1690 = vrot.lane.b32.xlu0 %v3981_v20, %s3517_s14 }
 0xd99   :  { %v1558_v8 = vpop.permute.xlu1 %1557 }
 0xd9b   :  { %v1556_v29 = vpop.permute.xlu0 %1555 }
 0xd9c   :  { %3163 = vmatprep.mubr.msk.f32.mxu0 %vm258_vm3, %v1556_v29 }
 0xd9d   :  { %3164 = vmatmul.mubr.msk.f32.vlgmr.msra.gmra.mxu0 %vm258_vm3, %v1558_v8 }
 0xd9e   :  { %3167 = vmatpush3.msra.mxu0 %v3990_v10 }
 0xd9f   :  { %3168 = vmatprep.subr.mxu0 %v3711_v7 }
 0xda0   :  { %3169 = vmatpush3.msra.mxu0 %v3711_v7  ;;  %v3511_v7 = vld [vmem:[%s4371_s1 + $0x9] sm:$0xff] }
 0xda1   :  { %3170 = vmatprep.subr.mxu0 %v3718_v11 }
 0xda2   :  { %3171 = vmatpush3.msra.mxu0 %v3718_v11  ;;  %v1693_v14 = vpop.permute.xlu1 %1692  ;;  %v4013_v11 = vld [vmem:[%s4371_s1 + $0x15] ss:$0 sm:$0xff] }
 0xda3   :  { %3191 = vmatprep.subr.msk.mxu0 %vm265_vm2, %v3510_v15  ;;  %v1697_v30 = vsel %vm258_vm3, %v1558_v8, %v1693_v14  ;;  %v224_v57 = vadd.f32 %v4013_v11, %v3658_v21  ;;  %v219_v34 = vadd.f32 %v4013_v11, %v3660_v22 }
 0xda4   :  { %v1691_v17 = vpop.permute.xlu0 %1690 }
 0xda5   :  { %v1696_v25 = vsel %vm258_vm3, %v1556_v29, %v1691_v17 }
 0xda6   :  { %3172 = vmatprep.mubr.msk.f32.mxu0 %vm553_vm4, %v1696_v25 }
 0xda7   :  { %3173 = vmatmul.mubr.msk.f32.vlgmr.msra.gmra.mxu0 %vm553_vm4, %v1697_v30 }
 0xda8   :  { %3192 = vmatpush3.msk.msra.mxu0 %vm265_vm2, %v3510_v15 }
 0xda9   :  { %3193 = vmatprep.subr.mxu0 %v3511_v7 }
 0xdaa   :  { %3194 = vmatpush3.msra.mxu0 %v3511_v7 }
 0xdab   :  { %3198 = vmatprep.subr.mxu0 %v3990_v10 }
 0xe5d   :  { %v3165_v54 = vpop.f32.mrf.mxu0 }
 0xe5e   :  { %v1639_v35 = vadd.f32 %v3165_v54, %v224_v57 }
 0xe5f   :  { %v1629_v37 = vpop.f32.mrf.mxu0 }
 0xe60   :  { %3397 = vtanh.f32 %v1639_v35  ;;  %v1638_v38 = vadd.f32 %v1629_v37, %v219_v34  ;;  %v2903_v61 = vmul.f32 -1.442695, %v1639_v35 }
 0xe62   :  { %3399 = vtanh.f32 %v1638_v38  ;;  %v2902_v46 = vmul.f32 -1.442695, %v1638_v38 }
 0xe67   :  { %v3174_v40 = vpop.f32.mrf.mxu0 }
 0xe68   :  { %v1776_v51 = vadd.f32 %v3174_v40, %v3740_v32 }
 0xe69   :  { %v1770_v55 = vpop.f32.mrf.mxu0 }
 0xe6a   :  { %3401 = vtanh.f32 %v1776_v51  ;;  %v1771_v42 = vadd.f32 %v3740_v32, %v1770_v55  ;;  %v2907_v47 = vmul.f32 -1.442695, %v1776_v51 }
 0xe6c   :  { %3403 = vtanh.f32 %v1771_v42  ;;  %v2906_v48 = vmul.f32 -1.442695, %v1771_v42 }
 0xe6d   :  { %v3398_v44 = vpop.eup %3397  ;;  %3405 = vpow2.f32 %v2903_v61  ;;  %v4065_v61 = vld [vmem:[%s4371_s1 + $0x1e] sm:$0xff] }
 0xe6e   :  { %1660 = vrot.lane.b32.xlu1 %v3398_v44, %s3517_s14  ;;  %3407 = vpow2.f32 %v2902_v46  ;;  %v4072_v46 = vld [vmem:[%s4371_s1 + $0x16] sm:$0xff] }
 0xe6f   :  { %v3400_v21 = vpop.eup %3399  ;;  %3409 = vpow2.f32 %v2907_v47 }
 0xe70   :  { %1658 = vrot.lane.b32.xlu0 %v3400_v21, %s3517_s14  ;;  %3411 = vpow2.f32 %v2906_v48 }
 0xe77   :  { %v3402_v22 = vpop.eup %3401 }
 0xe78   :  { %1799 = vrot.lane.b32.xlu1 %v3402_v22, %s3517_s14 }
 0xe79   :  { %v3404_v59 = vpop.eup %3403 }
 0xe7a   :  { %1797 = vrot.lane.b32.xlu0 %v3404_v59, %s3517_s14  ;;  %v3406_v32 = vpop.eup %3405 }
 0xe7b   :  { %v3408_v49 = vpop.eup %3407  ;;  %v1647_v52 = vadd.f32 1.0, %v3406_v32 }
 0xe7c   :  { %v1646_v56 = vadd.f32 1.0, %v3408_v49  ;;  %v3410_v60 = vpop.eup %3409 }
 0xe7d   :  { %3413 = vrcp.f32 %v1647_v52  ;;  %v3412_v13 = vpop.eup %3411  ;;  %v1786_v62 = vadd.f32 1.0, %v3410_v60  ;;  %v234_v52 = vadd.f32 %v4013_v11, %v3662_v23  ;;  %v229_v60 = vadd.f32 %v4013_v11, %v3664_v24 }
 0xe7e   :  { %3415 = vrcp.f32 %v1646_v56  ;;  %v1785_v63 = vadd.f32 1.0, %v3412_v13 }
 0xe7f   :  { %3417 = vrcp.f32 %v1786_v62 }
 0xe80   :  { %3419 = vrcp.f32 %v1785_v63 }
 0xe8a   :  { %v3414_v31 = vpop.eup %3413 }
 0xe8b   :  { %v3416_v2 = vpop.eup %3415  ;;  %v1655_v29 = vmul.f32 %v3414_v31, %v3956_v58 }
 0xe8c   :  { %v3418_v41 = vpop.eup %3417  ;;  %v1654_v15 = vmul.f32 %v3416_v2, %v3960_v16 }
 0xe8d   :  { %v3420_v5 = vpop.eup %3419  ;;  %v1794_v30 = vmul.f32 %v3418_v41, %v3964_v28 }
 0xe8e   :  { %v1793_v54 = vmul.f32 %v3420_v5, %v3968_v0 }
 0xee0   :  { %v1661_v33 = vpop.permute.xlu1 %1660 }
 0xee1   :  { %v1665_v36 = vmul.f32 %v3414_v31, %v1661_v33  ;;  %v4093_v33 = vld [vmem:[%s4371_s1 + $0x2e] ss:$0 sm:$0xff] }
 0xee2   :  { %v1659_v3 = vpop.permute.xlu0 %1658 }
 0xee3   :  { %1670 = vrot.lane.b32.xlu1 %v1665_v36, %s3516_s23  ;;  %v1664_v39 = vmul.f32 %v3416_v2, %v1659_v3 }
 0xee5   :  { %1668 = vrot.lane.b32.xlu0 %v1664_v39, %s3516_s23 }
 0xeea   :  { %v1800_v4 = vpop.permute.xlu1 %1799 }
 0xeeb   :  { %v1804_v1 = vmul.f32 %v3418_v41, %v1800_v4 }
 0xeec   :  { %v1798_v6 = vpop.permute.xlu0 %1797 }
 0xeed   :  { %1809 = vrot.lane.b32.xlu1 %v1804_v1, %s3516_s23  ;;  %v1803_v19 = vmul.f32 %v3420_v5, %v1798_v6 }
 0xeef   :  { %1807 = vrot.lane.b32.xlu0 %v1803_v19, %s3516_s23 }
 0xf55   :  { %v1671_v8 = vpop.permute.xlu1 %1670 }
 0xf56   :  { %v4030_v14 = vadd.f32 %v1671_v8, %v1655_v29 }
 0xf57   :  { %v1669_v17 = vpop.permute.xlu0 %1668 }
 0xf58   :  { %3421 = vtanh.f32 %v4030_v14  ;;  %v4034_v25 = vadd.f32 %v1669_v17, %v1654_v15 }
 0xf5a   :  { %3423 = vtanh.f32 %v4034_v25 }
 0xf5f   :  { %v1810_v7 = vpop.permute.xlu1 %1809 }
 0xf60   :  { %v4038_v57 = vadd.f32 %v1810_v7, %v1794_v30 }
 0xf61   :  { %v1808_v58 = vpop.permute.xlu0 %1807 }
 0xf62   :  { %3425 = vtanh.f32 %v4038_v57  ;;  %v4042_v34 = vadd.f32 %v1808_v58, %v1793_v54 }
 0xf64   :  { %3427 = vtanh.f32 %v4042_v34 }
 0xf65   :  { %v3422_v16 = vpop.eup %3421 }
 0xf66   :  { %1682 = vrot.lane.b32.xlu1 %v3422_v16, %s3518_s15 }
 0xf67   :  { %v3424_v35 = vpop.eup %3423 }
 0xf68   :  { %1680 = vrot.lane.b32.xlu0 %v3424_v35, %s3518_s15 }
 0xf6f   :  { %v3426_v37 = vpop.eup %3425 }
 0xf70   :  { %1821 = vrot.lane.b32.xlu1 %v3426_v37, %s3518_s15 }
 0xf71   :  { %v3428_v28 = vpop.eup %3427 }
 0xf72   :  { %1819 = vrot.lane.b32.xlu0 %v3428_v28, %s3518_s15 }
 0xfd8   :  { %v1683_v0 = vpop.permute.xlu1 %1682 }
 0xfd9   :  { %v1687_v38 = vmul.f32 %v3414_v31, %v1683_v0 }
 0xfda   :  { %v1681_v40 = vpop.permute.xlu0 %1680 }
 0xfdb   :  { %1841 = vrot.lane.b32.xlu1 %v1687_v38, %s3519_s20  ;;  %v1686_v51 = vmul.f32 %v3416_v2, %v1681_v40 }
 0xfdd   :  { %1839 = vrot.lane.b32.xlu0 %v1686_v51, %s3519_s20 }
 0xfe2   :  { %v1822_v55 = vpop.permute.xlu1 %1821 }
 0xfe3   :  { %v4051_v42 = vmul.f32 %v3418_v41, %v1822_v55 }
 0xfe4   :  { %v1820_v44 = vpop.permute.xlu0 %1819 }
 0xfe5   :  { %1976 = vrot.lane.b32.xlu1 %v4051_v42, %s3517_s14  ;;  %v4055_v21 = vmul.f32 %v3420_v5, %v1820_v44 }
 0xfe7   :  { %1974 = vrot.lane.b32.xlu0 %v4055_v21, %s3517_s14 }
0x104d   :  { %v1842_v59 = vpop.permute.xlu1 %1841 }
0x104f   :  { %v1840_v22 = vpop.permute.xlu0 %1839 }
0x1050   :  { %3179 = vmatprep.mubr.msk.f32.mxu1 %vm258_vm3, %v1840_v22 }
0x1051   :  { %3180 = vmatmul.mubr.msk.f32.vlgmr.msra.gmra.mxu1 %vm258_vm3, %v1842_v59 }
0x1052   :  { %3183 = vmatpush3.msra.mxu1 %v3990_v10 }
0x1053   :  { %3184 = vmatprep.subr.mxu1 %v4065_v61 }
0x1054   :  { %3185 = vmatpush3.msra.mxu1 %v4065_v61 }
0x1055   :  { %3186 = vmatprep.subr.mxu1 %v4072_v46 }
0x1056   :  { %3187 = vmatpush3.msra.mxu1 %v4072_v46 }
0x1057   :  { %3207 = vmatprep.subr.mxu1 %v3990_v10  ;;  %v1977_v47 = vpop.permute.xlu1 %1976 }
0x1058   :  { %v1981_v49 = vsel %vm258_vm3, %v1842_v59, %v1977_v47 }
0x1059   :  { %v1975_v48 = vpop.permute.xlu0 %1974 }
0x105a   :  { %v1980_v32 = vsel %vm258_vm3, %v1840_v22, %v1975_v48 }
0x105b   :  { %3188 = vmatprep.mubr.msk.f32.mxu1 %vm553_vm4, %v1980_v32 }
0x105c   :  { %3189 = vmatmul.mubr.msk.f32.vlgmr.msra.gmra.mxu1 %vm553_vm4, %v1981_v49 }
0x105d   :  { %3208 = vmatpush3.msra.mxu1 %v3990_v10 }
0x105e   :  { %3209 = vmatprep.subr.mxu1 %v4065_v61 }
0x105f   :  { %3210 = vmatpush3.msra.mxu1 %v4065_v61 }
0x1060   :  { %3211 = vmatprep.subr.mxu1 %v4072_v46 }
0x1061   :  { %3212 = vmatpush3.msra.mxu1 %v4072_v46 }
0x1111   :  { %v3181_v56 = vpop.f32.mrf.mxu1 }
0x1112   :  { %v1923_v13 = vadd.f32 %v3181_v56, %v234_v52 }
0x1113   :  { %v1913_v62 = vpop.f32.mrf.mxu1 }
0x1114   :  { %3429 = vtanh.f32 %v1923_v13  ;;  %v1922_v63 = vadd.f32 %v1913_v62, %v229_v60  ;;  %v2912_v4 = vmul.f32 -1.442695, %v1923_v13 }
0x1116   :  { %3431 = vtanh.f32 %v1922_v63  ;;  %v2911_v1 = vmul.f32 -1.442695, %v1922_v63 }
0x111c   :  { %v3190_v31 = vpop.f32.mrf.mxu1 }
0x111d   :  { %v2060_v36 = vadd.f32 %v4093_v33, %v3190_v31 }
0x111e   :  { %v2054_v2 = vpop.f32.mrf.mxu1 }
0x111f   :  { %3433 = vtanh.f32 %v2060_v36  ;;  %v2055_v23 = vadd.f32 %v4093_v33, %v2054_v2  ;;  %v2916_v5 = vmul.f32 -1.442695, %v2060_v36 }
0x1121   :  { %v3430_v3 = vpop.eup %3429  ;;  %3435 = vtanh.f32 %v2055_v23  ;;  %v2915_v6 = vmul.f32 -1.442695, %v2055_v23 }
0x1122   :  { %1944 = vrot.lane.b32.xlu1 %v3430_v3, %s3517_s14  ;;  %3437 = vpow2.f32 %v2912_v4 }
0x1123   :  { %v3432_v24 = vpop.eup %3431  ;;  %3439 = vpow2.f32 %v2911_v1 }
0x1124   :  { %1942 = vrot.lane.b32.xlu0 %v3432_v24, %s3517_s14  ;;  %3441 = vpow2.f32 %v2916_v5 }
0x1125   :  { %3443 = vpow2.f32 %v2915_v6 }
0x112c   :  { %v3434_v39 = vpop.eup %3433 }
0x112d   :  { %2083 = vrot.lane.b32.xlu1 %v3434_v39, %s3517_s14 }
0x112e   :  { %v3436_v41 = vpop.eup %3435 }
0x112f   :  { %2081 = vrot.lane.b32.xlu0 %v3436_v41, %s3517_s14  ;;  %v3438_v19 = vpop.eup %3437 }
0x1130   :  { %v3440_v29 = vpop.eup %3439  ;;  %v1931_v8 = vadd.f32 1.0, %v3438_v19 }
0x1131   :  { %v1930_v15 = vadd.f32 1.0, %v3440_v29  ;;  %v3442_v17 = vpop.eup %3441 }
0x1132   :  { %3445 = vrcp.f32 %v1931_v8  ;;  %v3444_v30 = vpop.eup %3443  ;;  %v2070_v7 = vadd.f32 1.0, %v3442_v17 }
0x1133   :  { %3447 = vrcp.f32 %v1930_v15  ;;  %v2069_v54 = vadd.f32 1.0, %v3444_v30  ;;  %v244_v30 = vadd.f32 %v4013_v11, %v3666_v26 }
0x1134   :  { %3449 = vrcp.f32 %v2070_v7 }
0x1135   :  { %3451 = vrcp.f32 %v2069_v54 }
0x113f   :  { %v3446_v58 = vpop.eup %3445 }
0x1140   :  { %v3448_v37 = vpop.eup %3447  ;;  %v1939_v59 = vmul.f32 %v3446_v58, %v4030_v14 }
0x1141   :  { %v3450_v38 = vpop.eup %3449  ;;  %v1938_v32 = vmul.f32 %v3448_v37, %v4034_v25 }
0x1142   :  { %v3452_v55 = vpop.eup %3451  ;;  %v2078_v56 = vmul.f32 %v3450_v38, %v4038_v57 }
0x1143   :  { %v2077_v62 = vmul.f32 %v3452_v55, %v4042_v34 }
0x1194   :  { %v1945_v16 = vpop.permute.xlu1 %1944 }
0x1195   :  { %v1949_v35 = vmul.f32 %v3446_v58, %v1945_v16 }
0x1196   :  { %v1943_v28 = vpop.permute.xlu0 %1942 }
0x1197   :  { %1954 = vrot.lane.b32.xlu1 %v1949_v35, %s3516_s23  ;;  %v1948_v0 = vmul.f32 %v3448_v37, %v1943_v28 }
0x1199   :  { %1952 = vrot.lane.b32.xlu0 %v1948_v0, %s3516_s23 }
0x119f   :  { %v2084_v40 = vpop.permute.xlu1 %2083 }
0x11a0   :  { %v2088_v51 = vmul.f32 %v3450_v38, %v2084_v40 }
0x11a1   :  { %v2082_v44 = vpop.permute.xlu0 %2081 }
0x11a2   :  { %2093 = vrot.lane.b32.xlu1 %v2088_v51, %s3516_s23  ;;  %v2087_v22 = vmul.f32 %v3452_v55, %v2082_v44 }
0x11a4   :  { %2091 = vrot.lane.b32.xlu0 %v2087_v22, %s3516_s23 }
0x1209   :  { %v1955_v47 = vpop.permute.xlu1 %1954 }
0x120a   :  { %v4106_v48 = vadd.f32 %v1955_v47, %v1939_v59 }
0x120b   :  { %v1953_v49 = vpop.permute.xlu0 %1952 }
0x120c   :  { %3453 = vtanh.f32 %v4106_v48  ;;  %v4110_v52 = vadd.f32 %v1953_v49, %v1938_v32 }
0x120e   :  { %3455 = vtanh.f32 %v4110_v52 }
0x1214   :  { %v2094_v60 = vpop.permute.xlu1 %2093 }
0x1215   :  { %v4114_v13 = vadd.f32 %v2094_v60, %v2078_v56 }
0x1216   :  { %v2092_v14 = vpop.permute.xlu0 %2091 }
0x1217   :  { %3457 = vtanh.f32 %v4114_v13  ;;  %v4118_v63 = vadd.f32 %v2092_v14, %v2077_v62 }
0x1219   :  { %v3454_v25 = vpop.eup %3453  ;;  %3459 = vtanh.f32 %v4118_v63 }
0x121a   :  { %1966 = vrot.lane.b32.xlu1 %v3454_v25, %s3518_s15 }
0x121b   :  { %v3456_v31 = vpop.eup %3455 }
0x121c   :  { %1964 = vrot.lane.b32.xlu0 %v3456_v31, %s3518_s15 }
0x1224   :  { %v3458_v36 = vpop.eup %3457 }
0x1225   :  { %2105 = vrot.lane.b32.xlu1 %v3458_v36, %s3518_s15 }
0x1226   :  { %v3460_v57 = vpop.eup %3459 }
0x1227   :  { %2103 = vrot.lane.b32.xlu0 %v3460_v57, %s3518_s15 }
0x128c   :  { %v1967_v34 = vpop.permute.xlu1 %1966 }
0x128d   :  { %v1971_v2 = vmul.f32 %v3446_v58, %v1967_v34 }
0x128e   :  { %v1965_v23 = vpop.permute.xlu0 %1964 }
0x128f   :  { %2125 = vrot.lane.b32.xlu1 %v1971_v2, %s3519_s20  ;;  %v1970_v3 = vmul.f32 %v3448_v37, %v1965_v23 }
0x1291   :  { %2123 = vrot.lane.b32.xlu0 %v1970_v3, %s3519_s20 }
0x1297   :  { %v2106_v24 = vpop.permute.xlu1 %2105 }
0x1298   :  { %v4127_v39 = vmul.f32 %v3450_v38, %v2106_v24 }
0x1299   :  { %v2104_v41 = vpop.permute.xlu0 %2103 }
0x129a   :  { %2260 = vrot.lane.b32.xlu1 %v4127_v39, %s3517_s14  ;;  %v4131_v4 = vmul.f32 %v3452_v55, %v2104_v41 }
0x129c   :  { %2258 = vrot.lane.b32.xlu0 %v4131_v4, %s3517_s14 }
0x1301   :  { %v2126_v5 = vpop.permute.xlu1 %2125 }
0x1303   :  { %v2124_v1 = vpop.permute.xlu0 %2123 }
0x1304   :  { %3195 = vmatprep.mubr.msk.f32.mxu0 %vm258_vm3, %v2124_v1 }
0x1305   :  { %3196 = vmatmul.mubr.msk.f32.vlgmr.msra.gmra.mxu0 %vm258_vm3, %v2126_v5 }
0x1306   :  { %3199 = vmatpush3.msra.mxu0 %v3990_v10  ;;  %v239_v10 = vadd.f32 %v4013_v11, %v3668_v27 }
0x1307   :  { %3200 = vmatprep.subr.mxu0 %v4065_v61 }
0x1308   :  { %3201 = vmatpush3.msra.mxu0 %v4065_v61 }
0x1309   :  { %3202 = vmatprep.subr.mxu0 %v4072_v46 }
0x130a   :  { %3203 = vmatpush3.msra.mxu0 %v4072_v46 }
0x130c   :  { %v2261_v6 = vpop.permute.xlu1 %2260 }
0x130d   :  { %v2265_v8 = vsel %vm258_vm3, %v2126_v5, %v2261_v6 }
0x130e   :  { %v2259_v19 = vpop.permute.xlu0 %2258 }
0x130f   :  { %v2264_v29 = vsel %vm258_vm3, %v2124_v1, %v2259_v19 }
0x1310   :  { %3204 = vmatprep.mubr.msk.f32.mxu0 %vm553_vm4, %v2264_v29 }
0x1311   :  { %3205 = vmatmul.mubr.msk.f32.vlgmr.msra.gmra.mxu0 %vm553_vm4, %v2265_v8 }
0x13c5   :  { %v3197_v15 = vpop.f32.mrf.mxu0 }
0x13c6   :  { %v2207_v46 = vadd.f32 %v3197_v15, %v244_v30 }
0x13c7   :  { %v2197_v17 = vpop.f32.mrf.mxu0 }
0x13c8   :  { %v2206_v61 = vadd.f32 %v2197_v17, %v239_v10  ;;  %v2921_v28 = vmul.f32 -1.442695, %v2207_v46 }
0x13ca   :  { %3461 = vtanh.f32 %v2206_v61  ;;  %v2920_v11 = vmul.f32 -1.442695, %v2206_v61 }
0x13cb   :  { %3463 = vtanh.f32 %v2207_v46 }
0x13d1   :  { %v3206_v7 = vpop.f32.mrf.mxu0 }
0x13d2   :  { %v2344_v16 = vadd.f32 %v4093_v33, %v3206_v7 }
0x13d3   :  { %v2338_v54 = vpop.f32.mrf.mxu0 }
0x13d4   :  { %v2339_v58 = vadd.f32 %v4093_v33, %v2338_v54  ;;  %v2925_v38 = vmul.f32 -1.442695, %v2344_v16 }
0x13d6   :  { %3465 = vtanh.f32 %v2339_v58  ;;  %v2924_v0 = vmul.f32 -1.442695, %v2339_v58 }
0x13d7   :  { %v3462_v35 = vpop.eup %3461  ;;  %3467 = vtanh.f32 %v2344_v16 }
0x13d8   :  { %2226 = vrot.lane.b32.xlu0 %v3462_v35, %s3517_s14  ;;  %v3464_v27 = vpop.eup %3463  ;;  %3469 = vpow2.f32 %v2920_v11 }
0x13d9   :  { %3471 = vpow2.f32 %v2921_v28 }
0x13da   :  { %3473 = vpow2.f32 %v2924_v0 }
0x13db   :  { %3475 = vpow2.f32 %v2925_v38 }
0x13dc   :  { %2228 = vrot.lane.b32.xlu0 %v3464_v27, %s3517_s14 }
0x13e3   :  { %v3466_v37 = vpop.eup %3465 }
0x13e4   :  { %2365 = vrot.lane.b32.xlu1 %v3466_v37, %s3517_s14  ;;  %v3468_v26 = vpop.eup %3467 }
0x13e5   :  { %v3470_v40 = vpop.eup %3469 }
0x13e6   :  { %v2214_v51 = vadd.f32 1.0, %v3470_v40  ;;  %v3472_v55 = vpop.eup %3471 }
0x13e7   :  { %v2215_v44 = vadd.f32 1.0, %v3472_v55  ;;  %v3474_v22 = vpop.eup %3473 }
0x13e8   :  { %2367 = vrot.lane.b32.xlu1 %v3468_v26, %s3517_s14  ;;  %3477 = vrcp.f32 %v2214_v51  ;;  %v2353_v59 = vadd.f32 1.0, %v3474_v22  ;;  %v3476_v47 = vpop.eup %3475 }
0x13e9   :  { %3479 = vrcp.f32 %v2215_v44  ;;  %v2354_v32 = vadd.f32 1.0, %v3476_v47 }
0x13ea   :  { %3481 = vrcp.f32 %v2353_v59 }
0x13eb   :  { %3483 = vrcp.f32 %v2354_v32 }
0x13f5   :  { %v3478_v49 = vpop.eup %3477 }
0x13f6   :  { %v3480_v62 = vpop.eup %3479  ;;  %v2222_v3 = vmul.f32 %v3478_v49, %v4110_v52 }
0x13f7   :  { %v3482_v31 = vpop.eup %3481  ;;  %v2223_v1 = vmul.f32 %v3480_v62, %v4106_v48 }
0x13f8   :  { %v3484_v34 = vpop.eup %3483  ;;  %v2361_v19 = vmul.f32 %v3482_v31, %v4118_v63 }
0x13f9   :  { %v2362_v52 = vmul.f32 %v3484_v34, %v4114_v13 }
0x144a   :  { %v2227_v56 = vpop.permute.xlu0 %2226 }
0x144b   :  { %v2232_v60 = vmul.f32 %v3478_v49, %v2227_v56 }
0x144d   :  { %2236 = vrot.lane.b32.xlu0 %v2232_v60, %s3516_s23 }
0x144e   :  { %v2229_v14 = vpop.permute.xlu0 %2228 }
0x144f   :  { %v2233_v25 = vmul.f32 %v3480_v62, %v2229_v14 }
0x1451   :  { %2238 = vrot.lane.b32.xlu0 %v2233_v25, %s3516_s23 }
0x1456   :  { %v2366_v36 = vpop.permute.xlu1 %2365 }
0x1457   :  { %v2371_v57 = vmul.f32 %v3482_v31, %v2366_v36 }
0x1459   :  { %2375 = vrot.lane.b32.xlu1 %v2371_v57, %s3516_s23 }
0x145a   :  { %v2368_v2 = vpop.permute.xlu1 %2367 }
0x145b   :  { %v2372_v23 = vmul.f32 %v3484_v34, %v2368_v2 }
0x145d   :  { %2377 = vrot.lane.b32.xlu1 %v2372_v23, %s3516_s23 }
0x14bf   :  { %v2237_v24 = vpop.permute.xlu0 %2236 }
0x14c0   :  { %v4161_v41 = vadd.f32 %v2237_v24, %v2222_v3 }
0x14c2   :  { %3485 = vtanh.f32 %v4161_v41 }
0x14c3   :  { %v2239_v5 = vpop.permute.xlu0 %2238 }
0x14c4   :  { %v4165_v6 = vadd.f32 %v2239_v5, %v2223_v1  ;;  %v2587_v1 = vld [vmem:[%s4375_s3 + $0x8] sm:$0xf] }
0x14c5   :  { %3216 = vmatprep.subr.msk.mxu0 %vm265_vm2, %v2587_v1 }
0x14c6   :  { %3487 = vtanh.f32 %v4165_v6  ;;  %3217 = vmatpush3.msk.msra.mxu0 %vm265_vm2, %v2587_v1 }
0x14cb   :  { %v2376_v29 = vpop.permute.xlu1 %2375 }
0x14cc   :  { %v4169_v8 = vadd.f32 %v2376_v29, %v2361_v19  ;;  %v2586_v19 = vld [vmem:[%s4375_s3] sm:$0xff] }
0x14cd   :  { %3218 = vmatprep.subr.mxu0 %v2586_v19 }
0x14ce   :  { %3489 = vtanh.f32 %v4169_v8  ;;  %3219 = vmatpush3.msra.mxu0 %v2586_v19 }
0x14cf   :  { %v3486_v15 = vpop.eup %3485  ;;  %v2378_v10 = vpop.permute.xlu1 %2377 }
0x14d0   :  { %v2382_v17 = vadd.f32 %v2378_v10, %v2362_v52  ;;  %2248 = vrot.lane.b32.xlu0 %v3486_v15, %s3518_s15 }
0x14d2   :  { %3491 = vtanh.f32 %v2382_v17 }
0x14d3   :  { %v3488_v48 = vpop.eup %3487 }
0x14d4   :  { %2250 = vrot.lane.b32.xlu0 %v3488_v48, %s3518_s15 }
0x14db   :  { %v3490_v61 = vpop.eup %3489 }
0x14dc   :  { %2387 = vrot.lane.b32.xlu1 %v3490_v61, %s3518_s15 }
0x14df   :  { %v3492_v63 = vpop.eup %3491 }
0x14e0   :  { %2389 = vrot.lane.b32.xlu1 %v3492_v63, %s3518_s15 }
0x1542   :  { %v2249_v30 = vpop.permute.xlu0 %2248 }
0x1543   :  { %v2254_v46 = vmul.f32 %v3478_v49, %v2249_v30 }
0x1545   :  { %2407 = vrot.lane.b32.xlu0 %v2254_v46, %s3519_s20 }
0x1546   :  { %v2251_v13 = vpop.permute.xlu0 %2250 }
0x1547   :  { %v2255_v7 = vmul.f32 %v3480_v62, %v2251_v13 }
0x1549   :  { %2409 = vrot.lane.b32.xlu0 %v2255_v7, %s3519_s20 }
0x154e   :  { %v2388_v54 = vpop.permute.xlu1 %2387 }
0x154f   :  { %v4179_v58 = vmul.f32 %v3482_v31, %v2388_v54 }
0x1551   :  { %2413 = vrot.lane.b32.xlu1 %v4179_v58, %s3517_s14 }
0x1552   :  { %v2390_v16 = vpop.permute.xlu1 %2389 }
0x1553   :  { %v4183_v35 = vmul.f32 %v3484_v34, %v2390_v16 }
0x1555   :  { %2415 = vrot.lane.b32.xlu1 %v4183_v35, %s3517_s14 }
0x15b7   :  { %v2408_v27 = vpop.permute.xlu0 %2407 }
0x15b8   :  { %2560 = vst.msk [vmem:[%s4374_s5] sm:$0xff] %vm258_vm3, %v2408_v27 }
0x15bb   :  { %v2410_v37 = vpop.permute.xlu0 %2409 }
0x15bc   :  { %2561 = vst.msk [vmem:[%s4374_s5 + $0x8] sm:$0xff] %vm258_vm3, %v2410_v37 }
0x15c3   :  { %v2414_v26 = vpop.permute.xlu1 %2413 }
0x15c4   :  { %v2419_v11 = vsel %vm258_vm3, %v2408_v27, %v2414_v26 }
0x15c5   :  { %3213 = vmatprep.mubr.msk.f32.mxu1 %vm553_vm4, %v2419_v11 }
0x15c7   :  { %v2416_v28 = vpop.permute.xlu1 %2415 }
0x15c8   :  { %v2420_v0 = vsel %vm258_vm3, %v2410_v37, %v2416_v28 }
0x15c9   :  { %3214 = vmatmul.mubr.msk.f32.vlgmr.msra.gmra.mxu1 %vm553_vm4, %v2420_v0 }
0x1689   :  { %v3215_v38 = vpop.f32.mrf.mxu1 }
0x168a   :  { %v2499_v40 = vadd.f32 %v4093_v33, %v3215_v38 }
0x168b   :  { %v2493_v51 = vpop.f32.mrf.mxu1 }
0x168c   :  { %3493 = vtanh.f32 %v2499_v40  ;;  %v2494_v55 = vadd.f32 %v4093_v33, %v2493_v51  ;;  %v2929_v59 = vmul.f32 -1.442695, %v2499_v40 }
0x168e   :  { %3495 = vtanh.f32 %v2494_v55  ;;  %v2928_v47 = vmul.f32 -1.442695, %v2494_v55 }
0x168f   :  { %3497 = vpow2.f32 %v2929_v59 }
0x1690   :  { %3499 = vpow2.f32 %v2928_v47 }
0x1699   :  { %v3494_v44 = vpop.eup %3493 }
0x169a   :  { %2522 = vrot.lane.b32.xlu1 %v3494_v44, %s3517_s14  ;;  %v2934_v44 = vld [vmem:[%s4375_s3 + $0xc] ss:$0 sm:$0xff] }
0x169b   :  { %v3496_v22 = vpop.eup %3495 }
0x169c   :  { %2520 = vrot.lane.b32.xlu0 %v3496_v22, %s3517_s14  ;;  %v3498_v32 = vpop.eup %3497 }
0x169d   :  { %v3500_v49 = vpop.eup %3499  ;;  %v2509_v56 = vadd.f32 1.0, %v3498_v32 }
0x169e   :  { %v2508_v60 = vadd.f32 1.0, %v3500_v49 }
0x169f   :  { %3501 = vrcp.f32 %v2509_v56 }
0x16a0   :  { %3503 = vrcp.f32 %v2508_v60 }
0x16ac   :  { %v3502_v62 = vpop.eup %3501 }
0x16ad   :  { %v3504_v25 = vpop.eup %3503  ;;  %v2517_v57 = vmul.f32 %v3502_v62, %v2382_v17 }
0x16ae   :  { %v2516_v23 = vmul.f32 %v3504_v25, %v4169_v8 }
0x170c   :  { %v2523_v14 = vpop.permute.xlu1 %2522 }
0x170d   :  { %v2527_v33 = vmul.f32 %v3502_v62, %v2523_v14 }
0x170e   :  { %v2521_v31 = vpop.permute.xlu0 %2520 }
0x170f   :  { %2532 = vrot.lane.b32.xlu1 %v2527_v33, %s3516_s23  ;;  %v2526_v36 = vmul.f32 %v3504_v25, %v2521_v31 }
0x1711   :  { %2530 = vrot.lane.b32.xlu0 %v2526_v36, %s3516_s23 }
0x1781   :  { %v2533_v34 = vpop.permute.xlu1 %2532 }
0x1782   :  { %v2537_v2 = vadd.f32 %v2533_v34, %v2517_v57 }
0x1783   :  { %v2531_v3 = vpop.permute.xlu0 %2530 }
0x1784   :  { %3505 = vtanh.f32 %v2537_v2  ;;  %v2536_v24 = vadd.f32 %v2531_v3, %v2516_v23 }
0x1786   :  { %3507 = vtanh.f32 %v2536_v24 }
0x1791   :  { %v3506_v5 = vpop.eup %3505 }
0x1792   :  { %2544 = vrot.lane.b32.xlu1 %v3506_v5, %s3518_s15 }
0x1793   :  { %v3508_v29 = vpop.eup %3507 }
0x1794   :  { %2542 = vrot.lane.b32.xlu0 %v3508_v29, %s3518_s15  ;;  %s3520_s15 = smov 116  }
0x1796   :  { %695 = vrot.lane.b32.xlu1 %v3788_v43, %s3519_s20 }
0x1798   :  { %693 = vrot.lane.b32.xlu0 %v3792_v45, %s3519_s20 }
0x179a   :  { %979 = vrot.lane.b32.xlu1 %v3856_v9, %s3519_s20 }
0x179c   :  { %977 = vrot.lane.b32.xlu0 %v3860_v12, %s3519_s20 }
0x179e   :  { %1263 = vrot.lane.b32.xlu1 %v3917_v50, %s3519_s20 }
0x17a0   :  { %1261 = vrot.lane.b32.xlu0 %v3921_v53, %s3519_s20 }
0x17a2   :  { %1547 = vrot.lane.b32.xlu1 %v3977_v18, %s3519_s20 }
0x17a4   :  { %1545 = vrot.lane.b32.xlu0 %v3981_v20, %s3519_s20 }
0x17a6   :  { %1831 = vrot.lane.b32.xlu1 %v4051_v42, %s3519_s20 }
0x17a8   :  { %1829 = vrot.lane.b32.xlu0 %v4055_v21, %s3519_s20 }
0x17aa   :  { %2115 = vrot.lane.b32.xlu1 %v4127_v39, %s3519_s20 }
0x17ac   :  { %2113 = vrot.lane.b32.xlu0 %v4131_v4, %s3519_s20 }
0x17ae   :  { %2399 = vrot.lane.b32.xlu1 %v4183_v35, %s3519_s20 }
0x17b0   :  { %2397 = vrot.lane.b32.xlu0 %v4179_v58, %s3519_s20 }
0x1804   :  { %v2545_v43 = vpop.permute.xlu1 %2544 }
0x1805   :  { %v2549_v45 = vmul.f32 %v3502_v62, %v2545_v43 }
0x1806   :  { %v2543_v9 = vpop.permute.xlu0 %2542 }
0x1807   :  { %2554 = vrot.lane.b32.xlu1 %v2549_v45, %s3519_s20  ;;  %v2548_v12 = vmul.f32 %v3504_v25, %v2543_v9 }
0x1808   :  { %v696_v50 = vpop.permute.xlu1 %695 }
0x1809   :  { %700 = vst.msk [vmem:[#allocation2 + $0x8] sm:$0xff] %vm258_vm3, %v696_v50  ;;  %2552 = vrot.lane.b32.xlu0 %v2548_v12, %s3519_s20 }
0x180a   :  { %v694_v53 = vpop.permute.xlu0 %693 }
0x180b   :  { %2569 = vrot.lane.b32.xlu1 %v4165_v6, %s3520_s15  ;;  %699 = vst.msk [vmem:[#allocation2] sm:$0xff] %vm258_vm3, %v694_v53 }
0x180c   :  { %v980_v18 = vpop.permute.xlu1 %979 }
0x180d   :  { %984 = vst.msk [vmem:[#allocation2 + $0x18] sm:$0xff] %vm258_vm3, %v980_v18  ;;  %2567 = vrot.lane.b32.xlu0 %v4161_v41, %s3520_s15 }
0x180e   :  { %v978_v20 = vpop.permute.xlu0 %977 }
0x180f   :  { %2579 = vrot.lane.b32.xlu1 %v2537_v2, %s3520_s15  ;;  %983 = vst.msk [vmem:[#allocation2 + $0x10] sm:$0xff] %vm258_vm3, %v978_v20 }
0x1810   :  { %v1264_v42 = vpop.permute.xlu1 %1263  ;;  %v2590_v6 = vld [vmem:[#allocation2 + $0x8] sm:$0xff] }
0x1811   :  { %1268 = vst.msk [vmem:[#allocation2 + $0x28] sm:$0xff] %vm258_vm3, %v1264_v42  ;;  %2577 = vrot.lane.b32.xlu0 %v2536_v24, %s3520_s15 }
0x1812   :  { %v1262_v21 = vpop.permute.xlu0 %1261  ;;  %v2589_v39 = vld [vmem:[#allocation2] sm:$0xff] }
0x1813   :  { %1267 = vst.msk [vmem:[#allocation2 + $0x20] sm:$0xff] %vm258_vm3, %v1262_v21  ;;  %3220 = vmatprep.mubr.msk.f32.mxu0 %vm258_vm3, %v2589_v39 }
0x1814   :  { %v1548_v4 = vpop.permute.xlu1 %1547  ;;  %3221 = vmatmul.mubr.msk.f32.vlgmr.msra.gmra.mxu0 %vm258_vm3, %v2590_v6  ;;  %v2592_v15 = vld [vmem:[#allocation2 + $0x18] sm:$0xff] }
0x1815   :  { %1552 = vst.msk [vmem:[#allocation2 + $0x38] sm:$0xff] %vm258_vm3, %v1548_v4 }
0x1816   :  { %v1546_v41 = vpop.permute.xlu0 %1545  ;;  %v2591_v8 = vld [vmem:[#allocation2 + $0x10] sm:$0xff] }
0x1817   :  { %1551 = vst.msk [vmem:[#allocation2 + $0x30] sm:$0xff] %vm258_vm3, %v1546_v41  ;;  %3223 = vmatprep.mubr.msk.f32.mxu0 %vm258_vm3, %v2591_v8 }
0x1818   :  { %v1832_v52 = vpop.permute.xlu1 %1831  ;;  %3224 = vmatmul.mubr.msk.f32.gmra.mxu0 %vm258_vm3, %v2592_v15  ;;  %v2594_v61 = vld [vmem:[#allocation2 + $0x28] sm:$0xff] }
0x1819   :  { %1836 = vst.msk [vmem:[#allocation2 + $0x48] sm:$0xff] %vm258_vm3, %v1832_v52 }
0x181a   :  { %v1830_v10 = vpop.permute.xlu0 %1829  ;;  %v2593_v17 = vld [vmem:[#allocation2 + $0x20] sm:$0xff] }
0x181b   :  { %1835 = vst.msk [vmem:[#allocation2 + $0x40] sm:$0xff] %vm258_vm3, %v1830_v10  ;;  %3226 = vmatprep.mubr.msk.f32.mxu0 %vm258_vm3, %v2593_v17 }
0x181c   :  { %v2116_v48 = vpop.permute.xlu1 %2115  ;;  %3227 = vmatmul.mubr.msk.f32.gmra.mxu0 %vm258_vm3, %v2594_v61  ;;  %v2596_v13 = vld [vmem:[#allocation2 + $0x38] sm:$0xff] }
0x181d   :  { %2120 = vst.msk [vmem:[#allocation2 + $0x58] sm:$0xff] %vm258_vm3, %v2116_v48 }
0x181e   :  { %v2114_v63 = vpop.permute.xlu0 %2113  ;;  %v2595_v30 = vld [vmem:[#allocation2 + $0x30] sm:$0xff] }
0x181f   :  { %2119 = vst.msk [vmem:[#allocation2 + $0x50] sm:$0xff] %vm258_vm3, %v2114_v63  ;;  %3229 = vmatprep.mubr.msk.f32.mxu0 %vm258_vm3, %v2595_v30 }
0x1820   :  { %v2400_v46 = vpop.permute.xlu1 %2399  ;;  %3230 = vmatmul.mubr.msk.f32.gmra.mxu0 %vm258_vm3, %v2596_v13  ;;  %v2598_v58 = vld [vmem:[#allocation2 + $0x48] sm:$0xff] }
0x1821   :  { %2404 = vst.msk [vmem:[#allocation2 + $0x68] sm:$0xff] %vm258_vm3, %v2400_v46 }
0x1822   :  { %v2398_v7 = vpop.permute.xlu0 %2397  ;;  %v2597_v54 = vld [vmem:[#allocation2 + $0x40] sm:$0xff] }
0x1823   :  { %2403 = vst.msk [vmem:[#allocation2 + $0x60] sm:$0xff] %vm258_vm3, %v2398_v7  ;;  %3232 = vmatprep.mubr.msk.f32.mxu0 %vm258_vm3, %v2597_v54 }
0x1824   :  { %3233 = vmatmul.mubr.msk.f32.gmra.mxu0 %vm258_vm3, %v2598_v58  ;;  %v2600_v35 = vld [vmem:[#allocation2 + $0x58] sm:$0xff] }
0x1826   :  { %v2599_v16 = vld [vmem:[#allocation2 + $0x50] sm:$0xff] }
0x1827   :  { %3235 = vmatprep.mubr.msk.f32.mxu0 %vm258_vm3, %v2599_v16 }
0x1828   :  { %3236 = vmatmul.mubr.msk.f32.gmra.mxu0 %vm258_vm3, %v2600_v35  ;;  %v2602_v37 = vld [vmem:[#allocation2 + $0x68] sm:$0xff] }
0x182a   :  { %v2601_v27 = vld [vmem:[#allocation2 + $0x60] sm:$0xff] }
0x182b   :  { %3238 = vmatprep.mubr.msk.f32.mxu0 %vm258_vm3, %v2601_v27 }
0x182c   :  { %3239 = vmatmul.mubr.msk.f32.gmra.mxu0 %vm258_vm3, %v2602_v37 }
0x1879   :  { %v2555_v26 = vpop.permute.xlu1 %2554 }
0x187a   :  { %2559 = vst.msk [vmem:[#allocation2 + $0x78] sm:$0xff] %vm258_vm3, %v2555_v26  ;;  %2931 = vst.msk [vmem:[%s4374_s5 + $0x18] sm:$0xff] %vm258_vm3, %v2555_v26 }
0x187b   :  { %v2553_v11 = vpop.permute.xlu0 %2552 }
0x187c   :  { %2558 = vst.msk [vmem:[#allocation2 + $0x70] sm:$0xff] %vm258_vm3, %v2553_v11  ;;  %2930 = vst.msk [vmem:[%s4374_s5 + $0x10] sm:$0xff] %vm258_vm3, %v2553_v11 }
0x187d   :  { %v2570_v28 = vpop.permute.xlu1 %2569 }
0x187e   :  { %2574 = vst.msk [vmem:[%s4376_s6 + $0x8] sm:$0xff] %vm258_vm3, %v2570_v28 }
0x187f   :  { %v2568_v0 = vpop.permute.xlu0 %2567 }
0x1880   :  { %2573 = vst.msk [vmem:[%s4376_s6] sm:$0xff] %vm258_vm3, %v2568_v0 }
0x1881   :  { %v2580_v38 = vpop.permute.xlu1 %2579  ;;  %v2604_v55 = vld [vmem:[#allocation2 + $0x78] sm:$0xff] }
0x1882   :  { %2933 = vst.msk [vmem:[%s4376_s6 + $0x18] sm:$0xff] %vm258_vm3, %v2580_v38 }
0x1883   :  { %v2578_v40 = vpop.permute.xlu0 %2577  ;;  %v2603_v51 = vld [vmem:[#allocation2 + $0x70] sm:$0xff] }
0x1884   :  { %2932 = vst.msk [vmem:[%s4376_s6 + $0x10] sm:$0xff] %vm258_vm3, %v2578_v40  ;;  %3241 = vmatprep.mubr.msk.f32.mxu0 %vm258_vm3, %v2603_v51 }
0x1885   :  { %3242 = vmatmul.mubr.msk.f32.gmra.mxu0 %vm258_vm3, %v2604_v55 }
0x18d4   :  { %v3222_v22 = vpop.f32.mrf.mxu0 }
0x18d5   :  { %v2732_v59 = vadd.f32 %v3222_v22, %v2934_v44 }
0x18d6   :  { %v2726_v47 = vpop.f32.mrf.mxu0 }
0x18d7   :  { %2806 = vst.msk [vmem:[%s4377_s4 + $0x8] sm:$0xff] %vm49_vm1, %v2732_v59  ;;  %v2727_v32 = vadd.f32 %v2934_v44, %v2726_v47 }
0x18d8   :  { %v3225_v49 = vpop.f32.mrf.mxu0 }
0x18d9   :  { %2805 = vst.msk [vmem:[%s4377_s4] sm:$0xff] %vm49_vm1, %v2727_v32  ;;  %v2742_v56 = vadd.f32 %v3225_v49, %v2934_v44 }
0x18da   :  { %v2736_v60 = vpop.f32.mrf.mxu0 }
0x18db   :  { %2808 = vst.msk [vmem:[%s4377_s4 + $0x18] sm:$0xff] %vm49_vm1, %v2742_v56  ;;  %v2737_v62 = vadd.f32 %v2934_v44, %v2736_v60 }
0x18dc   :  { %v3228_v14 = vpop.f32.mrf.mxu0 }
0x18dd   :  { %2807 = vst.msk [vmem:[%s4377_s4 + $0x10] sm:$0xff] %vm49_vm1, %v2737_v62  ;;  %v2752_v33 = vadd.f32 %v3228_v14, %v2934_v44 }
0x18de   :  { %v2746_v25 = vpop.f32.mrf.mxu0 }
0x18df   :  { %2810 = vst.msk [vmem:[%s4377_s4 + $0x28] sm:$0xff] %vm49_vm1, %v2752_v33  ;;  %v2747_v31 = vadd.f32 %v2934_v44, %v2746_v25 }
0x18e0   :  { %v3231_v36 = vpop.f32.mrf.mxu0 }
0x18e1   :  { %2809 = vst.msk [vmem:[%s4377_s4 + $0x20] sm:$0xff] %vm49_vm1, %v2747_v31  ;;  %v2762_v57 = vadd.f32 %v3231_v36, %v2934_v44 }
0x18e2   :  { %v2756_v34 = vpop.f32.mrf.mxu0 }
0x18e3   :  { %2812 = vst.msk [vmem:[%s4377_s4 + $0x38] sm:$0xff] %vm49_vm1, %v2762_v57  ;;  %v2757_v2 = vadd.f32 %v2934_v44, %v2756_v34 }
0x18e4   :  { %v3234_v23 = vpop.f32.mrf.mxu0 }
0x18e5   :  { %2811 = vst.msk [vmem:[%s4377_s4 + $0x30] sm:$0xff] %vm49_vm1, %v2757_v2  ;;  %v2772_v3 = vadd.f32 %v3234_v23, %v2934_v44 }
0x18e6   :  { %v2766_v24 = vpop.f32.mrf.mxu0 }
0x18e7   :  { %2814 = vst.msk [vmem:[%s4377_s4 + $0x48] sm:$0xff] %vm49_vm1, %v2772_v3  ;;  %v2767_v1 = vadd.f32 %v2934_v44, %v2766_v24 }
0x18e8   :  { %v3237_v5 = vpop.f32.mrf.mxu0 }
0x18e9   :  { %2813 = vst.msk [vmem:[%s4377_s4 + $0x40] sm:$0xff] %vm49_vm1, %v2767_v1  ;;  %v2782_v19 = vadd.f32 %v3237_v5, %v2934_v44 }
0x18ea   :  { %v2776_v29 = vpop.f32.mrf.mxu0 }
0x18eb   :  { %2816 = vst.msk [vmem:[%s4377_s4 + $0x58] sm:$0xff] %vm49_vm1, %v2782_v19  ;;  %v2777_v43 = vadd.f32 %v2934_v44, %v2776_v29 }
0x18ec   :  { %v3240_v45 = vpop.f32.mrf.mxu0 }
0x18ed   :  { %2815 = vst.msk [vmem:[%s4377_s4 + $0x50] sm:$0xff] %vm49_vm1, %v2777_v43  ;;  %v2792_v9 = vadd.f32 %v3240_v45, %v2934_v44 }
0x18ee   :  { %v2786_v12 = vpop.f32.mrf.mxu0 }
0x18ef   :  { %2818 = vst.msk [vmem:[%s4377_s4 + $0x68] sm:$0xff] %vm49_vm1, %v2792_v9  ;;  %v2787_v50 = vadd.f32 %v2934_v44, %v2786_v12 }
0x18f1   :  { %2817 = vst.msk [vmem:[%s4377_s4 + $0x60] sm:$0xff] %vm49_vm1, %v2787_v50 }
0x1945   :  { %v3243_v53 = vpop.f32.mrf.mxu0 }
0x1946   :  { %v2802_v18 = vadd.f32 %v3243_v53, %v2934_v44 }
0x1947   :  { %v2796_v20 = vpop.f32.mrf.mxu0 }
0x1948   :  { %2820 = vst.msk [vmem:[%s4377_s4 + $0x78] sm:$0xff] %vm49_vm1, %v2802_v18  ;;  %v2797_v42 = vadd.f32 %v2934_v44, %v2796_v20 }
0x194a   :  { %2819 = vst.msk [vmem:[%s4377_s4 + $0x70] sm:$0xff] %vm49_vm1, %v2797_v42 }

</bundles_post_ra>
